<compile_context>
chip_gen: v7x
topology: tpu7x:2x2x1
jax: 0.10.0
libtpu: 0.0.40
codegen_flags: <defaults>
</compile_context>

<pallas_src>
import jax
import jax.numpy as jnp
from jax import lax
from jax.experimental import pallas as pl
from jax.experimental.pallas import tpu as pltpu


def _model4_kernel(x_ref, wf_ref, bf_ref, out_ref):
    # x_ref: (TB, 784) native float dtype, wf_ref: (784, 4) f32,
    # bf_ref: (1, 4) f32, out_ref: (TB, 4) f32.
    x = x_ref[...].astype(jnp.float32)                     # VPU cast, hidden under DMA
    h = jnp.dot(x, wf_ref[...],
                preferred_element_type=jnp.float32,
                precision=lax.Precision.HIGHEST) + bf_ref[...]      # (TB, 4)
    # log_softmax over the last dim (width 4 -> EUP exp/log, pure slack here).
    m = jnp.max(h, axis=-1, keepdims=True)
    z = h - m
    lse = jnp.log(jnp.sum(jnp.exp(z), axis=-1, keepdims=True))
    out_ref[...] = z - lse


def _round_up(n, m):
    return ((n + m - 1) // m) * m


def _pool_flatten_matrix():
    """A (784, 16) matrix s.t. x_flat @ A == avg_pool2d(x, 6).view(-1, 16)."""
    eye = jnp.eye(4, dtype=jnp.float32)
    # Width-pooling matrix: columns 24..27 dropped (avg_pool2d floor behavior).
    pw = jnp.zeros((28, 4), jnp.float32).at[:24, :].set(
        jnp.repeat(eye, 6, axis=0) / 6.0)          # (28, 4)
    ph = pw.T                                      # (4, 28)
    # A[r*28 + c, oh*4 + ow] = ph[oh, r] * pw[c, ow]
    a = jnp.einsum("or,cw->rcow", ph, pw).reshape(784, 16)
    return a


def model4_forward(x, params, *, tile_b=2048):
    """x: (B, 1, 28, 28) or anything reshapeable to (-1, 28, 28)."""
    w1, b1 = params["w1"], params["b1"]   # (9, 16), (9,)
    w2, b2 = params["w2"], params["b2"]   # (4, 9),  (4,)

    # Lane-dense input layout: (B, 784). Keep native float dtype (cast happens
    # in-kernel on the VPU so we never add an extra HBM pass in the wrapper).
    if x.dtype in (jnp.float32, jnp.bfloat16):
        x2 = x.reshape(-1, 28 * 28)
    else:
        # TODO(synk): raw uint8/int8 pixels could also be loaded natively and
        # scaled on the VPU; f32 wrapper cast is the safe fallback here.
        x2 = x.reshape(-1, 28 * 28).astype(jnp.float32)
    bsz = x2.shape[0]

    # Fold pool + flatten + linear1 + linear2 into one (784, 4) weight.
    a = _pool_flatten_matrix()                                       # (784, 16)
    wf = (a @ w1.T.astype(jnp.float32)) @ w2.T.astype(jnp.float32)   # (784, 4)
    bf = (b1.astype(jnp.float32) @ w2.T.astype(jnp.float32)
          + b2.astype(jnp.float32)).reshape(1, 4)                    # (1, 4)

    # Pad batch only to the sublane multiple (no full-tile padding waste).
    sublane = 8 if x2.dtype == jnp.float32 else 16
    bp = _round_up(bsz, sublane)
    if bp != bsz:
        x2 = jnp.pad(x2, ((0, bp - bsz), (0, 0)))   # padded rows sliced off below

    # Tile selection: big tiles to amortize per-step overhead, but always
    # leave >= 2 grid steps so v7x's two TensorCores both get work.
    tb = min(tile_b, bp)
    if bp > sublane:
        half = _round_up(pl.cdiv(bp, 2), sublane)
        tb = min(tb, half)
    tb = max(sublane, _round_up(tb, sublane))
    num_steps = pl.cdiv(bp, tb)   # partial final block handled by Pallas

    itemsize = x2.dtype.itemsize
    # VMEM budget: 2x double-buffered x tile + 2x out tile + fused weights.
    need = 2 * tb * 784 * itemsize + 2 * tb * 4 * 4 + 784 * 4 * 4 + 4 * 4
    vmem_limit = min(max(int(need * 1.3), 32 * 1024 * 1024), 60 * 1024 * 1024)

    cost = pl.CostEstimate(
        flops=2 * bp * 784 * 4,
        bytes_accessed=bp * 784 * itemsize + bp * 4 * 4 + 784 * 4 * 4 + 4 * 4,
        transcendentals=5 * bp,
    )

    out = pl.pallas_call(
        _model4_kernel,
        out_shape=jax.ShapeDtypeStruct((bp, 4), jnp.float32),
        grid=(num_steps,),
        in_specs=[
            pl.BlockSpec((tb, 784), lambda i: (i, 0)),   # x tile (pipelined)
            pl.BlockSpec((784, 4), lambda i: (0, 0)),    # fused weight (resident)
            pl.BlockSpec((1, 4), lambda i: (0, 0)),      # fused bias   (resident)
        ],
        out_specs=pl.BlockSpec((tb, 4), lambda i: (i, 0)),
        compiler_params=pltpu.CompilerParams(
            dimension_semantics=("parallel",),
            vmem_limit_bytes=vmem_limit),
        cost_estimate=cost,
    )(x2, wf, bf)

    return out[:bsz]


def init_params(key):
    """Deterministic init mimicking torch.nn.Linear defaults (U(-k, k), k=1/sqrt(fan_in))."""
    k1, k2, k3, k4 = jax.random.split(key, 4)
    b1_bound = 1.0 / jnp.sqrt(16.0)
    b2_bound = 1.0 / jnp.sqrt(9.0)
    return {
        "w1": jax.random.uniform(k1, (9, 16), jnp.float32, -b1_bound, b1_bound),
        "b1": jax.random.uniform(k2, (9,), jnp.float32, -b1_bound, b1_bound),
        "w2": jax.random.uniform(k3, (4, 9), jnp.float32, -b2_bound, b2_bound),
        "b2": jax.random.uniform(k4, (4,), jnp.float32, -b2_bound, b2_bound),
    }


def reference_forward(x, params):
    """Pure-JAX reference matching the PyTorch module."""
    x3 = x.reshape(-1, 28, 28).astype(jnp.float32)
    b = x3.shape[0]
    pooled = x3[:, :24, :24].reshape(b, 4, 6, 4, 6).mean(axis=(2, 4)).reshape(b, 16)
    h1 = pooled @ params["w1"].T + params["b1"]
    h2 = h1 @ params["w2"].T + params["b2"]
    return jax.nn.log_softmax(h2, axis=-1)


if __name__ == "__main__":
    key = jax.random.PRNGKey(0)
    k_x, k_p = jax.random.split(key)

    x = jax.random.normal(k_x, (2, 1, 28, 28), jnp.float32)   # NCHW, MNIST-like
    params = init_params(k_p)

    out = model4_forward(x, params)
    out = jax.block_until_ready(out)

    ref = reference_forward(x, params)
    err = float(jnp.max(jnp.abs(out - ref)))
    assert out.shape == (2, 4), out.shape
    assert err < 1e-3, f"mismatch vs reference: {err}"

    print("KERNEL_OK")
</pallas_src>

<mosaic_0001>
module attributes {stable_mosaic.version = 11 : i64} {
  func.func @_model4_kernel(%arg0: i32, %arg1: memref<8x784xf32, #tpu.memory_space<vmem>>, %arg2: memref<784x4xf32, #tpu.memory_space<vmem>>, %arg3: memref<1x4xf32, #tpu.memory_space<vmem>>, %arg4: memref<8x4xf32, #tpu.memory_space<vmem>>) attributes {dimension_semantics = [#tpu.dimension_semantics<parallel>], iteration_bounds = array<i64: 1>, scalar_prefetch = 0 : i64, scratch_operands = 0 : i64, tpu.core_type = #tpu.core_type<tc>, window_params = [{transform_indices = @transform_0, window_bounds = array<i64: 8, 784>}, {pipeline_mode = #tpu.pipeline_mode<synchronous>, transform_indices = @transform_1, window_bounds = array<i64: 784, 4>}, {pipeline_mode = #tpu.pipeline_mode<synchronous>, transform_indices = @transform_2, window_bounds = array<i64: 1, 4>}, {transform_indices = @transform_3, window_bounds = array<i64: 8, 4>}]} {
    %c0 = arith.constant 0 : index
    %c0_0 = arith.constant 0 : index
    %0 = vector.load %arg1[%c0, %c0_0] : memref<8x784xf32, #tpu.memory_space<vmem>>, vector<8x784xf32>
    %c0_1 = arith.constant 0 : index
    %c0_2 = arith.constant 0 : index
    %1 = vector.load %arg2[%c0_1, %c0_2] : memref<784x4xf32, #tpu.memory_space<vmem>>, vector<784x4xf32>
    %cst = arith.constant dense<0.000000e+00> : vector<8x4xf32>
    %2 = tpu.matmul %0, %1, %cst {dimension_numbers = #tpu.dot_dimension_numbers<[1], [0], [0], [1], [0, 0, 1, 1], [], []>, precision = #tpu.contract_precision<fp32>} : vector<8x784xf32>, vector<784x4xf32>, vector<8x4xf32> -> vector<8x4xf32>
    %c0_3 = arith.constant 0 : index
    %c0_4 = arith.constant 0 : index
    %3 = vector.load %arg3[%c0_3, %c0_4] : memref<1x4xf32, #tpu.memory_space<vmem>>, vector<1x4xf32>
    %4 = vector.broadcast %3 : vector<1x4xf32> to vector<8x4xf32>
    %5 = arith.addf %2, %4 : vector<8x4xf32>
    %cst_5 = arith.constant dense<0xFF800000> : vector<8xf32>
    %6 = vector.multi_reduction <maximumf>, %5, %cst_5 [1] : vector<8x4xf32> to vector<8xf32>
    %7 = vector.shape_cast %6 : vector<8xf32> to vector<8x1xf32>
    %8 = vector.broadcast %7 : vector<8x1xf32> to vector<8x4xf32>
    %9 = arith.subf %5, %8 : vector<8x4xf32>
    %10 = math.exp %9 : vector<8x4xf32>
    %cst_6 = arith.constant dense<0.000000e+00> : vector<8xf32>
    %11 = vector.multi_reduction <add>, %10, %cst_6 [1] : vector<8x4xf32> to vector<8xf32>
    %12 = vector.shape_cast %11 : vector<8xf32> to vector<8x1xf32>
    %13 = math.log %12 : vector<8x1xf32>
    %14 = vector.broadcast %13 : vector<8x1xf32> to vector<8x4xf32>
    %15 = arith.subf %9, %14 : vector<8x4xf32>
    %c0_7 = arith.constant 0 : index
    %c0_8 = arith.constant 0 : index
    %16 = vector.load %arg4[%c0_7, %c0_8] : memref<8x4xf32, #tpu.memory_space<vmem>>, vector<8x4xf32>
    tpu.vector_store %arg4[%c0_7, %c0_8], %15 {strides = array<i32>} : memref<8x4xf32, #tpu.memory_space<vmem>>, vector<8x4xf32>,
    return
  }
  func.func @transform_0(%arg0: i32) -> (i32, i32) {
    %c0_i32 = arith.constant 0 : i32
    %c0_i32_0 = arith.constant 0 : i32
    return %arg0, %c0_i32 : i32, i32
  }
  func.func @transform_1(%arg0: i32) -> (i32, i32) {
    %c0_i32 = arith.constant 0 : i32
    %c0_i32_0 = arith.constant 0 : i32
    %c0_i32_1 = arith.constant 0 : i32
    return %c0_i32, %c0_i32_0 : i32, i32
  }
  func.func @transform_2(%arg0: i32) -> (i32, i32) {
    %c0_i32 = arith.constant 0 : i32
    %c0_i32_0 = arith.constant 0 : i32
    %c0_i32_1 = arith.constant 0 : i32
    return %c0_i32, %c0_i32_0 : i32, i32
  }
  func.func @transform_3(%arg0: i32) -> (i32, i32) {
    %c0_i32 = arith.constant 0 : i32
    %c0_i32_0 = arith.constant 0 : i32
    return %arg0, %c0_i32 : i32, i32
  }
}

</mosaic_0001>

<bundles_post_ra>
// kernel: tpu_custom_call.1
= control target key start
LH: loop header
LB: loop body
LE: loop exit
PB: predicated region body
PF: predicated region fallthrough
CT: control target
= control target key end

     0   :  { %vm126_vm0 = vcmask 130048   ;;  %vm4496_vm1 = vmmov 0   ;;  %vm3175_vm2 = vcmask 31744   ;;  %s6172_s1 = inlined_call_operand.vmem [shape: f32[784,4], index: 1, kind: input, shape index: {}]   ;;  %s6173_s0 = inlined_call_operand.vmem [shape: f32[8,784], index: 0, kind: input, shape index: {}]   ;;  %s6174_s2 = inlined_call_operand.vmem [shape: f32[1,4], index: 2, kind: input, shape index: {}]   ;;  %s6175_s3 = inlined_call_operand.vmem [shape: f32[8,4], index: 3, kind: output, shape index: {}]  }
   0x1   :  { %v37_v0 = vld [vmem:[%s6172_s1 + $0x80] sm:$0xff]  ;;  %v38_v1 = vld [vmem:[%s6172_s1 + $0x88] sm:$0xff]  ;;  %v39_v7 = vld [vmem:[%s6172_s1 + $0x90] sm:$0xff] }
   0x2   :  { %v21_v2 = vld [vmem:[%s6172_s1] sm:$0xff]  ;;  %v179_v3 = vand.u32 4294901760, %v37_v0  ;;  %v182_v4 = vand.u32 4294901760, %v38_v1  ;;  %v22_v5 = vld [vmem:[%s6172_s1 + $0x8] sm:$0xff]  ;;  %v40_v8 = vld [vmem:[%s6172_s1 + $0x98] sm:$0xff]  ;;  %v185_v10 = vand.u32 4294901760, %v39_v7 }
   0x3   :  { %v131_v6 = vand.u32 4294901760, %v21_v2  ;;  %v134_v9 = vand.u32 4294901760, %v22_v5  ;;  %v188_v11 = vand.u32 4294901760, %v40_v8  ;;  %v23_v12 = vld [vmem:[%s6172_s1 + $0x10] sm:$0xff]  ;;  %v24_v13 = vld [vmem:[%s6172_s1 + $0x18] sm:$0xff]  ;;  %v41_v18 = vld [vmem:[%s6172_s1 + $0xa0] sm:$0xff] }
   0x4   :  { %v4542_v14 = vpack.c.bf16 %v182_v4, %v179_v3  ;;  %v137_v16 = vand.u32 4294901760, %v23_v12  ;;  %v140_v17 = vand.u32 4294901760, %v24_v13  ;;  %v42_v19 = vld [vmem:[%s6172_s1 + $0xa8] sm:$0xff]  ;;  %v25_v23 = vld [vmem:[%s6172_s1 + $0x20] sm:$0xff]  ;;  %v4565_v25 = vsub.f32 %v39_v7, %v185_v10  ;;  %v43_v37 = vld [vmem:[%s6172_s1 + $0xb0] sm:$0xff] }
   0x5   :  { %v4544_v15 = vsub.f32 %v21_v2, %v131_v6  ;;  %v4552_v20 = vpack.c.bf16 %v134_v9, %v131_v6  ;;  %v4554_v21 = vsub.f32 %v22_v5, %v134_v9  ;;  %v4556_v22 = vpack.c.bf16 %v188_v11, %v185_v10  ;;  %v26_v24 = vld [vmem:[%s6172_s1 + $0x28] sm:$0xff]  ;;  %v44_v42 = vld [vmem:[%s6172_s1 + $0xb8] sm:$0xff]  ;;  %v27_v55 = vld [vmem:[%s6172_s1 + $0x30] sm:$0xff] }
   0x6   :  { %3885 = vmatprep.subr.bf16.mxu0 %v4542_v14  ;;  %v4567_v26 = vsub.f32 %v40_v8, %v188_v11  ;;  %v4569_v27 = vpack.c.bf16 %v140_v17, %v137_v16  ;;  %v4571_v28 = vsub.f32 %v23_v12, %v137_v16  ;;  %v191_v29 = vand.u32 4294901760, %v41_v18  ;;  %v28_v56 = vld [vmem:[%s6172_s1 + $0x38] sm:$0xff]  ;;  %v45_v5 = vld [vmem:[%s6172_s1 + $0xc0] sm:$0xff]  ;;  %v46_v6 = vld [vmem:[%s6172_s1 + $0xc8] sm:$0xff] }
   0x7   :  { %3887 = vmatpush3.bf16.msra.mxu0 %v4552_v20  ;;  %v194_v30 = vand.u32 4294901760, %v42_v19  ;;  %v4574_v31 = vsub.f32 %v37_v0, %v179_v3  ;;  %v4576_v32 = vsub.f32 %v38_v1, %v182_v4  ;;  %v143_v33 = vand.u32 4294901760, %v25_v23  ;;  %v29_v11 = vld [vmem:[%s6172_s1 + $0x40] sm:$0xff] }
   0x8   :  { %3889 = vmatprep.subr.bf16.mxu0 %v4556_v22  ;;  %v146_v34 = vand.u32 4294901760, %v26_v24  ;;  %v6192_v35 = vand.u32 4294901760, %v4544_v15  ;;  %v6191_v36 = vand.u32 4294901760, %v4554_v21  ;;  %v4584_v38 = vsub.f32 %v24_v13, %v140_v17 }
   0x9   :  { %v4586_v39 = vpack.c.bf16 %v194_v30, %v191_v29  ;;  %v4588_v40 = vsub.f32 %v41_v18, %v191_v29  ;;  %v6197_v41 = vand.u32 4294901760, %v4574_v31  ;;  %v4594_v43 = vsub.f32 %v42_v19, %v194_v30  ;;  %v30_v29 = vld [vmem:[%s6172_s1 + $0x48] sm:$0xff] }
   0xa   :  { %v6194_v44 = vand.u32 4294901760, %v4576_v32  ;;  %v4597_v45 = vpack.c.bf16 %v146_v34, %v143_v33  ;;  %v4599_v46 = vsub.f32 %v25_v23, %v143_v33  ;;  %v246_v48 = vsub.f32 %v4544_v15, %v6192_v35 }
   0xb   :  { %3891 = vmatpush3.bf16.msra.mxu0 %v4569_v27  ;;  %v358_v47 = vsub.f32 %v4574_v31, %v6197_v41  ;;  %v253_v49 = vsub.f32 %v4554_v21, %v6191_v36  ;;  %v197_v50 = vand.u32 4294901760, %v43_v37  ;;  %v200_v52 = vand.u32 4294901760, %v44_v42 }
   0xc   :  { %3893 = vmatprep.subr.bf16.mxu0 %v4586_v39  ;;  %v365_v51 = vsub.f32 %v4576_v32, %v6194_v44  ;;  %v6189_v53 = vand.u32 4294901760, %v4565_v25  ;;  %v6188_v54 = vand.u32 4294901760, %v4567_v26  ;;  %v4623_v58 = vsub.f32 %v26_v24, %v146_v34 }
   0xd   :  { %v359_v57 = vand.u32 4294901760, %v358_v47  ;;  %v247_v59 = vand.u32 4294901760, %v246_v48  ;;  %v254_v60 = vand.u32 4294901760, %v253_v49  ;;  %v4625_v62 = vpack.c.bf16 %v200_v52, %v197_v50 }
   0xe   :  { %v366_v61 = vand.u32 4294901760, %v365_v51  ;;  %v4627_v63 = vsub.f32 %v43_v37, %v197_v50  ;;  %v372_v0 = vsub.f32 %v4565_v25, %v6189_v53  ;;  %v379_v2 = vsub.f32 %v4567_v26, %v6188_v54 }
   0xf   :  { %3895 = vmatpush3.bf16.msra.mxu0 %v4597_v45  ;;  %v3918_v1 = vpack.c.bf16 %v254_v60, %v247_v59  ;;  %v149_v3 = vand.u32 4294901760, %v27_v55  ;;  %v152_v4 = vand.u32 4294901760, %v28_v56  ;;  %v6187_v9 = vand.u32 4294901760, %v4571_v28 }
  0x10   :  { %v3916_v7 = vpack.c.bf16 %v366_v61, %v359_v57  ;;  %3897 = vmatprep.subr.bf16.mxu0 %v4625_v62  ;;  %v373_v8 = vand.u32 4294901760, %v372_v0  ;;  %v6184_v10 = vand.u32 4294901760, %v4584_v38  ;;  %v4648_v12 = vsub.f32 %v44_v42, %v200_v52  ;;  %v48_v57 = vld [vmem:[%s6172_s1 + $0xd8] sm:$0xff] }
  0x11   :  { %v380_v13 = vand.u32 4294901760, %v379_v2  ;;  %v4650_v16 = vpack.c.bf16 %v152_v4, %v149_v3  ;;  %v4652_v17 = vsub.f32 %v27_v55, %v149_v3  ;;  %v260_v18 = vsub.f32 %v4571_v28, %v6187_v9 }
  0x12   :  { %3917 = vmatprep.subr.bf16.mxu1 %v3916_v7  ;;  %v267_v19 = vsub.f32 %v4584_v38, %v6184_v10  ;;  %v203_v23 = vand.u32 4294901760, %v45_v5  ;;  %v206_v24 = vand.u32 4294901760, %v46_v6  ;;  %v6182_v33 = vand.u32 4294901760, %v4588_v40 }
  0x13   :  { %3919 = vmatpush3.bf16.msra.mxu1 %v3918_v1  ;;  %v3920_v30 = vpack.c.bf16 %v380_v13, %v373_v8  ;;  %3899 = vmatpush3.bf16.msra.mxu0 %v4650_v16  ;;  %v6181_v34 = vand.u32 4294901760, %v4594_v43  ;;  %v155_v37 = vand.u32 4294901760, %v29_v11  ;;  %v4666_v42 = vsub.f32 %v28_v56, %v152_v4  ;;  %v47_v56 = vld [vmem:[%s6172_s1 + $0xd0] sm:$0xff] }
  0x14   :  { %v261_v47 = vand.u32 4294901760, %v260_v18  ;;  %v268_v48 = vand.u32 4294901760, %v267_v19  ;;  %v4668_v49 = vpack.c.bf16 %v206_v24, %v203_v23  ;;  %v4670_v50 = vsub.f32 %v45_v5, %v203_v23  ;;  %v31_v1 = vld [vmem:[%s6172_s1 + $0x50] sm:$0xff]  ;;  %v32_v18 = vld [vmem:[%s6172_s1 + $0x58] sm:$0xff] }
  0x15   :  { %3921 = vmatprep.subr.bf16.mxu1 %v3920_v30  ;;  %v386_v51 = vsub.f32 %v4588_v40, %v6182_v33  ;;  %v393_v52 = vsub.f32 %v4594_v43, %v6181_v34  ;;  %v158_v55 = vand.u32 4294901760, %v30_v29  ;;  %v4685_v60 = vsub.f32 %v46_v6, %v206_v24 }
  0x16   :  { %v3922_v59 = vpack.c.bf16 %v268_v48, %v261_v47  ;;  %3901 = vmatprep.subr.bf16.mxu0 %v4668_v49  ;;  %v6179_v61 = vand.u32 4294901760, %v4599_v46  ;;  %v6178_v0 = vand.u32 4294901760, %v4623_v58  ;;  %v4694_v5 = vsub.f32 %v29_v11, %v155_v37 }
  0x17   :  { %v387_v2 = vand.u32 4294901760, %v386_v51  ;;  %v394_v3 = vand.u32 4294901760, %v393_v52  ;;  %v4692_v4 = vpack.c.bf16 %v158_v55, %v155_v37  ;;  %v209_v8 = vand.u32 4294901760, %v47_v56 }
  0x18   :  { %3923 = vmatpush3.bf16.msra.mxu1 %v3922_v59  ;;  %v274_v6 = vsub.f32 %v4599_v46, %v6179_v61  ;;  %v281_v7 = vsub.f32 %v4623_v58, %v6178_v0  ;;  %v212_v13 = vand.u32 4294901760, %v48_v57  ;;  %v6177_v11 = vand.u32 4294901760, %v4627_v63 }
  0x19   :  { %v3924_v19 = vpack.c.bf16 %v394_v3, %v387_v2  ;;  %3903 = vmatpush3.bf16.msra.mxu0 %v4692_v4  ;;  %v6176_v23 = vand.u32 4294901760, %v4648_v12  ;;  %v161_v24 = vand.u32 4294901760, %v31_v1  ;;  %v4708_v30 = vsub.f32 %v30_v29, %v158_v55  ;;  %v49_v29 = vld [vmem:[%s6172_s1 + $0xe0] sm:$0xff]  ;;  %v50_v55 = vld [vmem:[%s6172_s1 + $0xe8] sm:$0xff] }
  0x1a   :  { %v275_v37 = vand.u32 4294901760, %v274_v6  ;;  %v282_v47 = vand.u32 4294901760, %v281_v7  ;;  %v4710_v48 = vpack.c.bf16 %v212_v13, %v209_v8  ;;  %v4712_v51 = vsub.f32 %v47_v56, %v209_v8  ;;  %v33_v8 = vld [vmem:[%s6172_s1 + $0x60] sm:$0xff] }
  0x1b   :  { %3925 = vmatprep.subr.bf16.mxu1 %v3924_v19  ;;  %v400_v52 = vsub.f32 %v4627_v63, %v6177_v11  ;;  %v407_v59 = vsub.f32 %v4648_v12, %v6176_v23  ;;  %v164_v2 = vand.u32 4294901760, %v32_v18  ;;  %v4727_v56 = vsub.f32 %v48_v57, %v212_v13 }
  0x1c   :  { %v3926_v3 = vpack.c.bf16 %v282_v47, %v275_v37  ;;  %3905 = vmatprep.subr.bf16.mxu0 %v4710_v48  ;;  %v6180_v6 = vand.u32 4294901760, %v4652_v17  ;;  %v6183_v7 = vand.u32 4294901760, %v4666_v42  ;;  %v4736_v0 = vsub.f32 %v31_v1, %v161_v24 }
  0x1d   :  { %v401_v19 = vand.u32 4294901760, %v400_v52  ;;  %v408_v23 = vand.u32 4294901760, %v407_v59  ;;  %v4734_v11 = vpack.c.bf16 %v164_v2, %v161_v24  ;;  %v215_v37 = vand.u32 4294901760, %v49_v29  ;;  %v34_v52 = vld [vmem:[%s6172_s1 + $0x68] sm:$0xff] }
  0x1e   :  { %3927 = vmatpush3.bf16.msra.mxu1 %v3926_v3  ;;  %v288_v57 = vsub.f32 %v4652_v17, %v6180_v6  ;;  %v295_v13 = vsub.f32 %v4666_v42, %v6183_v7  ;;  %v218_v47 = vand.u32 4294901760, %v50_v55  ;;  %v6186_v1 = vand.u32 4294901760, %v4670_v50 }
  0x1f   :  { %6309 = vst [vmem:[#allocation2_spill] sm:$0xff] %v4734_v11  ;;  %v3928_v59 = vpack.c.bf16 %v408_v23, %v401_v19  ;;  %3907 = vmatpush3.bf16.msra.mxu0 %v4734_v11  ;;  %v6185_v24 = vand.u32 4294901760, %v4685_v60  ;;  %v167_v3 = vand.u32 4294901760, %v33_v8  ;;  %v4750_v61 = vsub.f32 %v32_v18, %v164_v2  ;;  %v51_v18 = vld [vmem:[%s6172_s1 + $0xf0] sm:$0xff]  ;;  %v52_v2 = vld [vmem:[%s6172_s1 + $0xf8] sm:$0xff] }
  0x20   :  { %v289_v6 = vand.u32 4294901760, %v288_v57  ;;  %v296_v34 = vand.u32 4294901760, %v295_v13  ;;  %v4752_v33 = vpack.c.bf16 %v218_v47, %v215_v37  ;;  %v4754_v7 = vsub.f32 %v49_v29, %v215_v37 }
  0x21   :  { %3929 = vmatprep.subr.bf16.mxu1 %v3928_v59  ;;  %v414_v23 = vsub.f32 %v4670_v50, %v6186_v1  ;;  %v421_v19 = vsub.f32 %v4685_v60, %v6185_v24  ;;  %v170_v10 = vand.u32 4294901760, %v34_v52  ;;  %v4769_v29 = vsub.f32 %v50_v55, %v218_v47  ;;  %v35_v59 = vld [vmem:[%s6172_s1 + $0x70] sm:$0xff] }
  0x22   :  { %6310 = vst [vmem:[#allocation3_spill] sm:$0xff] %v4752_v33  ;;  %v3930_v57 = vpack.c.bf16 %v296_v34, %v289_v6  ;;  %3909 = vmatprep.subr.bf16.mxu0 %v4752_v33  ;;  %v6190_v13 = vand.u32 4294901760, %v4694_v5  ;;  %v6193_v37 = vand.u32 4294901760, %v4708_v30  ;;  %v4778_v54 = vsub.f32 %v33_v8, %v167_v3 }
  0x23   :  { %v415_v24 = vand.u32 4294901760, %v414_v23  ;;  %v422_v1 = vand.u32 4294901760, %v421_v19  ;;  %v4776_v9 = vpack.c.bf16 %v170_v10, %v167_v3  ;;  %v221_v6 = vand.u32 4294901760, %v51_v18  ;;  %v36_v23 = vld [vmem:[%s6172_s1 + $0x78] sm:$0xff] }
  0x24   :  { %3931 = vmatpush3.bf16.msra.mxu1 %v3930_v57  ;;  %v302_v34 = vsub.f32 %v4694_v5, %v6190_v13  ;;  %v309_v55 = vsub.f32 %v4708_v30, %v6193_v37  ;;  %v224_v47 = vand.u32 4294901760, %v52_v2  ;;  %v6196_v8 = vand.u32 4294901760, %v4712_v51 }
  0x25   :  { %6311 = vst [vmem:[#allocation4_spill] sm:$0xff] %v4776_v9  ;;  %v3932_v19 = vpack.c.bf16 %v422_v1, %v415_v24  ;;  %3911 = vmatpush3.bf16.msra.mxu0 %v4776_v9  ;;  %v6195_v3 = vand.u32 4294901760, %v4727_v56  ;;  %v173_v57 = vand.u32 4294901760, %v35_v59  ;;  %v4792_v53 = vsub.f32 %v34_v52, %v170_v10  ;;  %v15_v10 = vld [vmem:[%s6173_s0 + $0x8] sm:$0xff] }
  0x26   :  { %v303_v13 = vand.u32 4294901760, %v302_v34  ;;  %v310_v36 = vand.u32 4294901760, %v309_v55  ;;  %v4794_v35 = vpack.c.bf16 %v224_v47, %v221_v6  ;;  %v4796_v37 = vsub.f32 %v51_v18, %v221_v6  ;;  %v14_v6 = vld [vmem:[%s6173_s0] sm:$0xff] }
  0x27   :  { %3933 = vmatprep.subr.bf16.mxu1 %v3932_v19  ;;  %v428_v1 = vsub.f32 %v4712_v51, %v6196_v8  ;;  %v435_v24 = vsub.f32 %v4727_v56, %v6195_v3  ;;  %v176_v44 = vand.u32 4294901760, %v36_v23  ;;  %v4808_v34 = vsub.f32 %v52_v2, %v224_v47 }
  0x28   :  { %6312 = vst [vmem:[#allocation5_spill] sm:$0xff] %v4794_v35  ;;  %v3934_v52 = vpack.c.bf16 %v310_v36, %v303_v13  ;;  %3913 = vmatprep.subr.bf16.mxu0 %v4794_v35  ;;  %v6200_v18 = vand.u32 4294901760, %v4736_v0  ;;  %v6201_v55 = vand.u32 4294901760, %v4750_v61  ;;  %v4817_v41 = vsub.f32 %v35_v59, %v173_v57 }
  0x29   :  { %v429_v19 = vand.u32 4294901760, %v428_v1  ;;  %v436_v3 = vand.u32 4294901760, %v435_v24  ;;  %v4815_v8 = vpack.c.bf16 %v176_v44, %v173_v57  ;;  %v4825_v13 = vand.u32 4294901760, %v15_v10 }
  0x2a   :  { %3935 = vmatpush3.bf16.msra.mxu1 %v3934_v52  ;;  %v316_v36 = vsub.f32 %v4736_v0, %v6200_v18  ;;  %v323_v2 = vsub.f32 %v4750_v61, %v6201_v55  ;;  %v6204_v47 = vand.u32 4294901760, %v4754_v7  ;;  %v6210_v1 = vand.u32 4294901760, %v4769_v29 }
  0x2b   :  { %6313 = vst [vmem:[#allocation6_spill] sm:$0xff] %v4815_v8  ;;  %6314 = vst [vmem:[#allocation7_spill] sm:$0xff] %v4825_v13  ;;  %v3936_v35 = vpack.c.bf16 %v436_v3, %v429_v19  ;;  %3915 = vmatpush3.bf16.msra.mxu0 %v4815_v8  ;;  %v3948_v59 = vpack.c.bf16 %v4576_v32, %v4574_v31  ;;  %v4832_v57 = vand.u32 4294901760, %v14_v6  ;;  %467 = vmatprep.mubr.f32.mxu1 %v4825_v13 }
  0x2c   :  { %v317_v24 = vand.u32 4294901760, %v316_v36  ;;  %v324_v52 = vand.u32 4294901760, %v323_v2  ;;  %v4835_v18 = vsub.f32 %v15_v10, %v4825_v13  ;;  %v442_v55 = vsub.f32 %v4754_v7, %v6204_v47 }
  0x2d   :  { %3937 = vmatprep.subr.bf16.mxu1 %v3936_v35  ;;  %v449_v3 = vsub.f32 %v4769_v29, %v6210_v1  ;;  %3949 = vmatprep.subr.bf16.mxu0 %v3948_v59  ;;  %v4845_v19 = vsub.f32 %v14_v6, %v4832_v57  ;;  %v6209_v36 = vand.u32 4294901760, %v4778_v54  ;;  %v6211_v10 = vand.u32 4294901760, %v4792_v53 }
  0x2e   :  { %v4849_v2 = vsub.f32 %v36_v23, %v176_v44  ;;  %v3938_v8 = vpack.c.bf16 %v324_v52, %v317_v24  ;;  %v6212_v47 = vand.u32 4294901760, %v4835_v18  ;;  %v443_v9 = vand.u32 4294901760, %v442_v55 }
  0x2f   :  { %v450_v13 = vand.u32 4294901760, %v449_v3  ;;  %v234_v35 = vand.u32 4294901760, %v4845_v19  ;;  %v330_v59 = vsub.f32 %v4778_v54, %v6209_v36  ;;  %v337_v6 = vsub.f32 %v4792_v53, %v6211_v10 }
  0x30   :  { %3939 = vmatpush3.bf16.msra.mxu1 %v3938_v8  ;;  %v229_v44 = vsub.f32 %v4835_v18, %v6212_v47  ;;  %v3950_v23 = vpack.c.bf16 %v4554_v21, %v4544_v15  ;;  %v6217_v55 = vand.u32 4294901760, %v4796_v37  ;;  %v6220_v24 = vand.u32 4294901760, %v4808_v34 }
  0x31   :  { %v3940_v52 = vpack.c.bf16 %v450_v13, %v443_v9  ;;  %v235_v3 = vsub.f32 %v4845_v19, %v234_v35  ;;  %v331_v36 = vand.u32 4294901760, %v330_v59  ;;  %v338_v1 = vand.u32 4294901760, %v337_v6 }
  0x32   :  { %v230_v10 = vand.u32 4294901760, %v229_v44  ;;  %v456_v8 = vsub.f32 %v4796_v37, %v6217_v55  ;;  %v463_v47 = vsub.f32 %v4808_v34, %v6220_v24  ;;  %v6219_v33 = vand.u32 4294901760, %v4817_v41 }
  0x33   :  { %3941 = vmatprep.subr.bf16.mxu1 %v3940_v52  ;;  %v236_v11 = vand.u32 4294901760, %v235_v3  ;;  %v3942_v9 = vpack.c.bf16 %v338_v1, %v331_v36  ;;  %v3952_v13 = vpack.c.bf16 %v4567_v26, %v4565_v25  ;;  %v6218_v59 = vand.u32 4294901760, %v4849_v2 }
  0x34   :  { %231 = vmatprep.mubr.f32.mxu0 %v230_v10  ;;  %v457_v6 = vand.u32 4294901760, %v456_v8  ;;  %v464_v44 = vand.u32 4294901760, %v463_v47  ;;  %v344_v55 = vsub.f32 %v4817_v41, %v6219_v33  ;;  %v3954_v3 = vpack.c.bf16 %v4584_v38, %v4571_v28 }
  0x35   :  { %237 = vmatmul.mubr.f32.vlgmr.msra.gmra.mrb[0].mxu0 %v236_v11  ;;  %3943 = vmatpush3.bf16.msra.mxu1 %v3942_v9  ;;  %v351_v52 = vsub.f32 %v4849_v2, %v6218_v59  ;;  %v3956_v10 = vpack.c.bf16 %v4594_v43, %v4588_v40  ;;  %v3958_v11 = vpack.c.bf16 %v4623_v58, %v4599_v46  ;;  %v6316_v9 = vand.u32 4294901760, %v4576_v32 }
  0x36   :  { %3951 = vmatpush3.bf16.msra.mxu0 %v3950_v23  ;;  %v3944_v1 = vpack.c.bf16 %v464_v44, %v457_v6  ;;  %v345_v36 = vand.u32 4294901760, %v344_v55  ;;  %604 = vmatprep.mubr.f32.mxu0 %v4835_v18  ;;  %v3960_v8 = vpack.c.bf16 %v4648_v12, %v4627_v63  ;;  %v6315_v55 = vand.u32 4294901760, %v4574_v31 }
  0x37   :  { %3953 = vmatprep.subr.bf16.mxu0 %v3952_v13  ;;  %v352_v47 = vand.u32 4294901760, %v351_v52  ;;  %v6317_v44 = vand.u32 4294901760, %v4544_v15  ;;  %v6318_v13 = vand.u32 4294901760, %v4554_v21  ;;  %v6319_v59 = vand.u32 4294901760, %v4565_v25 }
  0x38   :  { %3945 = vmatprep.subr.bf16.mxu1 %v3944_v1  ;;  %v4012_v6 = vpack.c.bf16 %v6316_v9, %v6315_v55  ;;  %v6320_v1 = vand.u32 4294901760, %v4567_v26  ;;  %v6321_v24 = vand.u32 4294901760, %v4571_v28  ;;  %v6323_v31 = vand.u32 4294901760, %v4588_v40 }
  0x39   :  { %v3946_v23 = vpack.c.bf16 %v352_v47, %v345_v36  ;;  %v4014_v52 = vpack.c.bf16 %v6318_v13, %v6317_v44  ;;  %v6322_v36 = vand.u32 4294901760, %v4584_v38  ;;  %v6324_v32 = vand.u32 4294901760, %v4594_v43  ;;  %v6338_v13 = vld [vmem:[#allocation7_spill] sm:$0xff] }
  0x3a   :  { %v4016_v33 = vpack.c.bf16 %v6320_v1, %v6319_v59  ;;  %3955 = vmatpush3.bf16.msra.mxu0 %v3954_v3  ;;  %v6325_v15 = vand.u32 4294901760, %v4599_v46  ;;  %v6326_v21 = vand.u32 4294901760, %v4623_v58  ;;  %v6327_v25 = vand.u32 4294901760, %v4627_v63  ;;  %v70_v1 = vld [vmem:[%s6172_s1 + $0x188] sm:$0xff] }
  0x3b   :  { %v4018_v47 = vpack.c.bf16 %v6322_v36, %v6321_v24  ;;  %v4020_v55 = vpack.c.bf16 %v6324_v32, %v6323_v31  ;;  %v6328_v26 = vand.u32 4294901760, %v4648_v12  ;;  %3947 = vmatpush3.bf16.msra.mxu1 %v3946_v23  ;;  %3957 = vmatprep.subr.bf16.mxu0 %v3956_v10  ;;  %v6329_v28 = vand.u32 4294901760, %v4652_v17  ;;  %v53_v36 = vld [vmem:[%s6172_s1 + $0x100] sm:$0xff]  ;;  %v6339_v31 = vld [vmem:[#allocation4_spill] sm:$0xff]  ;;  %v6340_v32 = vld [vmem:[#allocation5_spill] sm:$0xff] }
  0x3c   :  { %v4918_v9 = vpack.c.bf16 %v6326_v21, %v6325_v15  ;;  %v6330_v38 = vand.u32 4294901760, %v4666_v42  ;;  %v6331_v43 = vand.u32 4294901760, %v4670_v50  ;;  %v6332_v46 = vand.u32 4294901760, %v4685_v60  ;;  %3981 = vmatprep.subr.bf16.mxu1 %v4542_v14 }
  0x3d   :  { %v4924_v59 = vpack.c.bf16 %v6328_v26, %v6327_v25  ;;  %v6333_v63 = vand.u32 4294901760, %v4694_v5  ;;  %v6334_v12 = vand.u32 4294901760, %v4708_v30  ;;  %v3962_v3 = vpack.c.bf16 %v4666_v42, %v4652_v17  ;;  %v6341_v26 = vld [vmem:[#allocation6_spill] sm:$0xff] }
  0x3e   :  { %v4930_v40 = vpack.c.bf16 %v6330_v38, %v6329_v28  ;;  %v4936_v58 = vpack.c.bf16 %v6332_v46, %v6331_v43  ;;  %469 = vmatmul.mubr.f32.vlgmr.msra.gmra.mrb[0].mxu1 %v4832_v57  ;;  %3959 = vmatpush3.bf16.msra.mxu0 %v3958_v11  ;;  %v3964_v10 = vpack.c.bf16 %v4685_v60, %v4670_v50  ;;  %v6335_v23 = vand.u32 4294901760, %v4835_v18  ;;  %v6336_v18 = vld [vmem:[#allocation2_spill] sm:$0xff]  ;;  %v6337_v11 = vld [vmem:[#allocation3_spill] sm:$0xff]  ;;  %v71_v28 = vld [vmem:[%s6172_s1 + $0x190] sm:$0xff] }
  0x3f   :  { %v4942_v24 = vpack.c.bf16 %v6334_v12, %v6333_v63  ;;  %3983 = vmatpush3.bf16.msra.mxu1 %v4552_v20  ;;  %3961 = vmatprep.subr.bf16.mxu0 %v3960_v8  ;;  %v3966_v44 = vpack.c.bf16 %v4708_v30, %v4694_v5  ;;  %v3968_v17 = vpack.c.bf16 %v4727_v56, %v4712_v51  ;;  %v69_v8 = vld [vmem:[%s6172_s1 + $0x180] sm:$0xff]  ;;  %v1044_v15 = vand.u32 4294901760, %v70_v1  ;;  %v72_v38 = vld [vmem:[%s6172_s1 + $0x198] sm:$0xff]  ;;  %v55_v43 = vld [vmem:[%s6172_s1 + $0x110] sm:$0xff] }
  0x40   :  { %3985 = vmatprep.subr.bf16.mxu1 %v4556_v22  ;;  %711 = vmatprep.mubr.f32.mxu1 %v6335_v23  ;;  %v3970_v42 = vpack.c.bf16 %v4750_v61, %v4736_v0  ;;  %v3972_v50 = vpack.c.bf16 %v4769_v29, %v4754_v7  ;;  %v3974_v60 = vpack.c.bf16 %v4792_v53, %v4778_v54  ;;  %v993_v21 = vand.u32 4294901760, %v53_v36 }
  0x41   :  { %v3976_v5 = vpack.c.bf16 %v4808_v34, %v4796_v37  ;;  %v3978_v30 = vpack.c.bf16 %v4849_v2, %v4817_v41  ;;  %v6343_v12 = vand.u32 4294901760, %v4727_v56  ;;  %v1050_v23 = vand.u32 4294901760, %v72_v38 }
  0x42   :  { %3963 = vmatpush3.bf16.msra.mxu0 %v3962_v3  ;;  %v5012_v46 = vsub.f32 %v53_v36, %v993_v21 }
  0x43   :  { %3987 = vmatpush3.bf16.msra.mxu1 %v4569_v27  ;;  %3965 = vmatprep.subr.bf16.mxu0 %v3964_v10  ;;  %v1047_v10 = vand.u32 4294901760, %v71_v28 }
  0x44   :  { %3989 = vmatprep.subr.bf16.mxu1 %v4586_v39 }
  0x45   :  { %v5079_v36 = vpack.c.bf16 %v1050_v23, %v1047_v10 }
  0x46   :  { %3967 = vmatpush3.bf16.msra.mxu0 %v3966_v44  ;;  %v6344_v44 = vand.u32 4294901760, %v4736_v0  ;;  %v6349_v0 = vand.u32 4294901760, %v4792_v53  ;;  %v17_v53 = vld [vmem:[%s6173_s0 + $0x18] sm:$0xff] }
  0x47   :  { %3991 = vmatpush3.bf16.msra.mxu1 %v4597_v45  ;;  %3969 = vmatprep.subr.bf16.mxu0 %v3968_v17  ;;  %v6345_v17 = vand.u32 4294901760, %v4750_v61  ;;  %v6348_v61 = vand.u32 4294901760, %v4778_v54  ;;  %6354 = vst [vmem:[#allocation2_spill] sm:$0xff] %v5079_v36 }
  0x48   :  { %3993 = vmatprep.subr.bf16.mxu1 %v4625_v62 }
  0x4a   :  { %3971 = vmatpush3.bf16.msra.mxu0 %v3970_v42  ;;  %v4034_v42 = vpack.c.bf16 %v6345_v17, %v6344_v44  ;;  %v5089_v44 = vand.u32 4294901760, %v17_v53 }
  0x4b   :  { %3995 = vmatpush3.bf16.msra.mxu1 %v4650_v16  ;;  %3973 = vmatprep.subr.bf16.mxu0 %v3972_v50  ;;  %v73_v50 = vld [vmem:[%s6172_s1 + $0x1a0] sm:$0xff] }
  0x4c   :  { %3997 = vmatprep.subr.bf16.mxu1 %v4668_v49  ;;  %6356 = vst [vmem:[#allocation7_spill] sm:$0xff] %v5089_v44 }
  0x4e   :  { %3975 = vmatpush3.bf16.msra.mxu0 %v3974_v60 }
  0x4f   :  { %3999 = vmatpush3.bf16.msra.mxu1 %v4692_v4  ;;  %3977 = vmatprep.subr.bf16.mxu0 %v3976_v5  ;;  %v6352_v5 = vand.u32 4294901760, %v4817_v41  ;;  %v57_v41 = vld [vmem:[%s6172_s1 + $0x120] sm:$0xff] }
  0x50   :  { %4001 = vmatprep.subr.bf16.mxu1 %v4710_v48 }
  0x52   :  { %3979 = vmatpush3.bf16.msra.mxu0 %v3978_v30  ;;  %v6353_v30 = vand.u32 4294901760, %v4849_v2  ;;  %v6229_v2 = vand.u32 4294901760, %v5012_v46 }
  0x53   :  { %4003 = vmatpush3.bf16.msra.mxu1 %v6336_v18  ;;  %4013 = vmatprep.subr.bf16.mxu0 %v4012_v6  ;;  %v54_v6 = vld [vmem:[%s6172_s1 + $0x108] sm:$0xff] }
  0x54   :  { %4005 = vmatprep.subr.bf16.mxu1 %v6337_v11  ;;  %v996_v25 = vand.u32 4294901760, %v54_v6 }
  0x55   :  { %607 = vmatmul.mubr.f32.vlgmr.msra.gmra.mrb[2].mxu0 %v4845_v19  ;;  %v6346_v19 = vand.u32 4294901760, %v4754_v7  ;;  %v5046_v7 = vpack.c.bf16 %v6349_v0, %v6348_v61 }
  0x56   :  { %4015 = vmatpush3.bf16.msra.mxu0 %v4014_v52  ;;  %881 = vmatprep.mubr.f32.mxu0 %v6338_v13  ;;  %v1041_v52 = vand.u32 4294901760, %v69_v8  ;;  %v5014_v63 = vsub.f32 %v54_v6, %v996_v25  ;;  %v1053_v6 = vand.u32 4294901760, %v73_v50 }
  0x57   :  { %4007 = vmatpush3.bf16.msra.mxu1 %v6339_v31  ;;  %4017 = vmatprep.subr.bf16.mxu0 %v4016_v33 }
  0x58   :  { %4009 = vmatprep.subr.bf16.mxu1 %v6340_v32  ;;  %v5002_v33 = vsub.f32 %v69_v8, %v1041_v52  ;;  %v5058_v8 = vpack.c.bf16 %v6353_v30, %v6352_v5  ;;  %v5065_v54 = vpack.c.bf16 %v1044_v15, %v1041_v52  ;;  %v5117_v17 = vsub.f32 %v73_v50, %v1053_v6  ;;  %v60_v50 = vld [vmem:[%s6172_s1 + $0x138] sm:$0xff] }
  0x5a   :  { %4019 = vmatpush3.bf16.msra.mxu0 %v4018_v47  ;;  %v56_v47 = vld [vmem:[%s6172_s1 + $0x118] sm:$0xff] }
  0x5b   :  { %4011 = vmatpush3.bf16.msra.mxu1 %v6341_v26  ;;  %4021 = vmatprep.subr.bf16.mxu0 %v4020_v55  ;;  %v5010_v55 = vsub.f32 %v70_v1, %v1044_v15  ;;  %v1002_v56 = vand.u32 4294901760, %v56_v47  ;;  %v5077_v1 = vpack.c.bf16 %v996_v25, %v993_v21  ;;  %v5083_v15 = vsub.f32 %v71_v28, %v1047_v10  ;;  %v76_v28 = vld [vmem:[%s6172_s1 + $0x1b8] sm:$0xff] }
  0x5c   :  { %4045 = vmatprep.subr.bf16.mxu1 %v4542_v14  ;;  %v6342_v14 = vand.u32 4294901760, %v4712_v51  ;;  %v999_v51 = vand.u32 4294901760, %v55_v43  ;;  %v1005_v25 = vand.u32 4294901760, %v57_v41 }
  0x5e   :  { %715 = vmatmul.mubr.f32.vlgmr.msra.gmra.mrb[2].mxu1 %v234_v35  ;;  %4023 = vmatpush3.bf16.msra.mxu0 %v4918_v9  ;;  %v4032_v3 = vpack.c.bf16 %v6343_v12, %v6342_v14  ;;  %v6347_v35 = vand.u32 4294901760, %v4769_v29  ;;  %v6350_v29 = vand.u32 4294901760, %v4796_v37  ;;  %v6230_v37 = vand.u32 4294901760, %v5010_v55 }
  0x5f   :  { %4047 = vmatpush3.bf16.msra.mxu1 %v4552_v20  ;;  %4025 = vmatprep.subr.bf16.mxu0 %v4924_v59  ;;  %v74_v20 = vld [vmem:[%s6172_s1 + $0x1a8] sm:$0xff]  ;;  %v6351_v59 = vand.u32 4294901760, %v4808_v34  ;;  %v5085_v14 = vsub.f32 %v72_v38, %v1050_v23  ;;  %v5087_v12 = vpack.c.bf16 %v1002_v56, %v999_v51  ;;  %v5103_v38 = vsub.f32 %v56_v47, %v1002_v56 }
  0x60   :  { %v5033_v9 = vpack.c.bf16 %v6347_v35, %v6346_v19  ;;  %4049 = vmatprep.subr.bf16.mxu1 %v4556_v22  ;;  %985 = vmatprep.mubr.f32.mxu1 %v6338_v13  ;;  %v6233_v22 = vand.u32 4294901760, %v5002_v33  ;;  %v58_v34 = vld [vmem:[%s6172_s1 + $0x128] sm:$0xff]  ;;  %v6228_v13 = vand.u32 4294901760, %v5014_v63  ;;  %v1056_v52 = vand.u32 4294901760, %v74_v20 }
  0x61   :  { %v5052_v60 = vpack.c.bf16 %v6351_v59, %v6350_v29  ;;  %6355 = vst [vmem:[#allocation3_spill] sm:$0xff] %v5087_v12  ;;  %v5122_v19 = vsub.f32 %v17_v53, %v5089_v44  ;;  %v6224_v56 = vand.u32 4294901760, %v5083_v15  ;;  %v6223_v61 = vand.u32 4294901760, %v5085_v14 }
  0x62   :  { %4027 = vmatpush3.bf16.msra.mxu0 %v4930_v40  ;;  %v5092_v40 = vsub.f32 %v55_v43, %v999_v51  ;;  %v1220_v21 = vsub.f32 %v5002_v33, %v6233_v22  ;;  %v1108_v43 = vsub.f32 %v5012_v46, %v6229_v2  ;;  %v1115_v10 = vsub.f32 %v5014_v63, %v6228_v13 }
  0x63   :  { %4051 = vmatpush3.bf16.msra.mxu1 %v4569_v27  ;;  %4029 = vmatprep.subr.bf16.mxu0 %v4936_v58  ;;  %v1008_v27 = vand.u32 4294901760, %v58_v34  ;;  %v75_v58 = vld [vmem:[%s6172_s1 + $0x1b0] sm:$0xff]  ;;  %v5115_v23 = vpack.c.bf16 %v1056_v52, %v1053_v6  ;;  %v5119_v47 = vsub.f32 %v74_v20, %v1056_v52  ;;  %v1062_v51 = vand.u32 4294901760, %v76_v28 }
  0x64   :  { %4053 = vmatprep.subr.bf16.mxu1 %v4586_v39  ;;  %v1227_v39 = vsub.f32 %v5010_v55, %v6230_v37  ;;  %v1059_v35 = vand.u32 4294901760, %v75_v58  ;;  %v1221_v20 = vand.u32 4294901760, %v1220_v21  ;;  %v1109_v59 = vand.u32 4294901760, %v1108_v43 }
  0x65   :  { %6357 = vst [vmem:[#allocation4_spill] sm:$0xff] %v5115_v23  ;;  %v5134_v0 = vpack.c.bf16 %v1008_v27, %v1005_v25  ;;  %v1116_v5 = vand.u32 4294901760, %v1115_v10  ;;  %v6221_v30 = vand.u32 4294901760, %v5092_v40  ;;  %v1014_v6 = vand.u32 4294901760, %v60_v50 }
  0x66   :  { %4031 = vmatpush3.bf16.msra.mxu0 %v4942_v24  ;;  %v59_v24 = vld [vmem:[%s6172_s1 + $0x130] sm:$0xff]  ;;  %v1228_v29 = vand.u32 4294901760, %v1227_v39  ;;  %v6222_v52 = vand.u32 4294901760, %v5103_v38  ;;  %v6234_v21 = vand.u32 4294901760, %v5122_v19  ;;  %v6225_v39 = vand.u32 4294901760, %v5119_v47 }
  0x67   :  { %4055 = vmatpush3.bf16.msra.mxu1 %v4597_v45  ;;  %4033 = vmatprep.subr.bf16.mxu0 %v4032_v3  ;;  %6358 = vst [vmem:[#allocation5_spill] sm:$0xff] %v5134_v0  ;;  %v5136_v45 = vsub.f32 %v57_v41, %v1005_v25  ;;  %v5138_v3 = vsub.f32 %v58_v34, %v1008_v27  ;;  %v1011_v53 = vand.u32 4294901760, %v59_v24 }
  0x68   :  { %4057 = vmatprep.subr.bf16.mxu1 %v4625_v62  ;;  %v77_v62 = vld [vmem:[%s6172_s1 + $0x1c0] sm:$0xff]  ;;  %v5148_v41 = vpack.c.bf16 %v1062_v51, %v1059_v35  ;;  %v1241_v34 = vsub.f32 %v5085_v14, %v6223_v61  ;;  %v5157_v25 = vsub.f32 %v75_v58, %v1059_v35  ;;  %v5159_v27 = vsub.f32 %v76_v28, %v1062_v51 }
  0x69   :  { %v5166_v43 = vpack.c.bf16 %v1228_v29, %v1221_v20  ;;  %v5168_v10 = vpack.c.bf16 %v1116_v5, %v1109_v59  ;;  %v1065_v58 = vand.u32 4294901760, %v77_v62  ;;  %v5174_v28 = vpack.c.bf16 %v1014_v6, %v1011_v53 }
  0x6a   :  { %4035 = vmatpush3.bf16.msra.mxu0 %v4034_v42  ;;  %6359 = vst [vmem:[#allocation6_spill] sm:$0xff] %v5148_v41  ;;  %v1234_v42 = vsub.f32 %v5083_v15, %v6224_v56  ;;  %v1129_v35 = vsub.f32 %v5103_v38, %v6222_v52  ;;  %v6226_v51 = vand.u32 4294901760, %v5136_v45  ;;  %v1091_v20 = vsub.f32 %v5122_v19, %v6234_v21  ;;  %v62_v56 = vld [vmem:[%s6172_s1 + $0x148] sm:$0xff] }
  0x6b   :  { %4059 = vmatpush3.bf16.msra.mxu1 %v4650_v16  ;;  %4037 = vmatprep.subr.bf16.mxu0 %v5033_v9  ;;  %v78_v16 = vld [vmem:[%s6172_s1 + $0x1c8] sm:$0xff]  ;;  %v6227_v9 = vand.u32 4294901760, %v5117_v17  ;;  %6360 = vst [vmem:[#allocation8_spill] sm:$0xff] %v5174_v28  ;;  %v1242_v59 = vand.u32 4294901760, %v1241_v34  ;;  %v5190_v52 = vsub.f32 %v59_v24, %v1011_v53  ;;  %v5192_v61 = vsub.f32 %v60_v50, %v1014_v6 }
  0x6c   :  { %4061 = vmatprep.subr.bf16.mxu1 %v4668_v49  ;;  %v1122_v49 = vsub.f32 %v5092_v40, %v6221_v30  ;;  %v1235_v29 = vand.u32 4294901760, %v1234_v42  ;;  %v1068_v5 = vand.u32 4294901760, %v78_v16  ;;  %v6231_v30 = vand.u32 4294901760, %v5138_v3 }
  0x6d   :  { %v5200_v34 = vsub.f32 %v77_v62, %v1065_v58  ;;  %v6235_v24 = vand.u32 4294901760, %v5159_v27  ;;  %v1130_v50 = vand.u32 4294901760, %v1129_v35  ;;  %v1136_v6 = vsub.f32 %v5136_v45, %v6226_v51  ;;  %v79_v62 = vld [vmem:[%s6172_s1 + $0x1d0] sm:$0xff] }
  0x6e   :  { %4039 = vmatpush3.bf16.msra.mxu0 %v5046_v7  ;;  %v61_v7 = vld [vmem:[%s6172_s1 + $0x140] sm:$0xff]  ;;  %v1123_v42 = vand.u32 4294901760, %v1122_v49  ;;  %v80_v49 = vld [vmem:[%s6172_s1 + $0x1d8] sm:$0xff]  ;;  %v5221_v35 = vpack.c.bf16 %v1068_v5, %v1065_v58  ;;  %v1143_v51 = vsub.f32 %v5138_v3, %v6231_v30  ;;  %v1020_v37 = vand.u32 4294901760, %v62_v56 }
  0x6f   :  { %4063 = vmatpush3.bf16.msra.mxu1 %v4692_v4  ;;  %4041 = vmatprep.subr.bf16.mxu0 %v5052_v60  ;;  %v1248_v4 = vsub.f32 %v5117_v17, %v6227_v9  ;;  %v1255_v60 = vsub.f32 %v5119_v47, %v6225_v39  ;;  %v1017_v53 = vand.u32 4294901760, %v61_v7  ;;  %v1092_v39 = vand.u32 4294901760, %v1091_v20  ;;  %v64_v58 = vld [vmem:[%s6172_s1 + $0x158] sm:$0xff] }
  0x70   :  { %4065 = vmatprep.subr.bf16.mxu1 %v4710_v48  ;;  %v6232_v48 = vand.u32 4294901760, %v5157_v25  ;;  %6361 = vst [vmem:[#allocation9_spill] sm:$0xff] %v5221_v35  ;;  %v5227_v9 = vsub.f32 %v78_v16, %v1068_v5  ;;  %v1071_v20 = vand.u32 4294901760, %v79_v62  ;;  %v1269_v16 = vsub.f32 %v5159_v27, %v6235_v24 }
  0x71   :  { %v1249_v13 = vand.u32 4294901760, %v1248_v4  ;;  %v1256_v2 = vand.u32 4294901760, %v1255_v60  ;;  %v5245_v5 = vsub.f32 %v61_v7, %v1017_v53  ;;  %v1137_v4 = vand.u32 4294901760, %v1136_v6 }
  0x72   :  { %4043 = vmatpush3.bf16.msra.mxu0 %v5058_v8  ;;  %v5219_v8 = vpack.c.bf16 %v1242_v59, %v1235_v29  ;;  %v1074_v29 = vand.u32 4294901760, %v80_v49  ;;  %v5243_v59 = vpack.c.bf16 %v1130_v50, %v1123_v42  ;;  %v1144_v30 = vand.u32 4294901760, %v1143_v51  ;;  %v81_v42 = vld [vmem:[%s6172_s1 + $0x1e0] sm:$0xff] }
  0x73   :  { %4067 = vmatpush3.bf16.msra.mxu1 %v6336_v18  ;;  %4077 = vmatprep.subr.bf16.mxu0 %v5065_v54  ;;  %v63_v18 = vld [vmem:[%s6172_s1 + $0x150] sm:$0xff]  ;;  %v1026_v22 = vand.u32 4294901760, %v64_v58  ;;  %v5255_v7 = vpack.c.bf16 %v1256_v2, %v1249_v13  ;;  %v5257_v50 = vpack.c.bf16 %v1020_v37, %v1017_v53  ;;  %v6236_v51 = vand.u32 4294901760, %v5200_v34 }
  0x74   :  { %4069 = vmatprep.subr.bf16.mxu1 %v6337_v11  ;;  %v1262_v11 = vsub.f32 %v5157_v25, %v6232_v48  ;;  %v1023_v48 = vand.u32 4294901760, %v63_v18  ;;  %v5265_v6 = vpack.c.bf16 %v1074_v29, %v1071_v20  ;;  %v1270_v21 = vand.u32 4294901760, %v1269_v16 }
  0x75   :  { %883 = vmatmul.mubr.f32.vlgmr.msra.gmra.mrb[4].mxu0 %v4832_v57  ;;  %v5276_v2 = vsub.f32 %v80_v49, %v1074_v29  ;;  %v6366_v13 = vand.u32 4294901760, %v5190_v52  ;;  %v1077_v53 = vand.u32 4294901760, %v81_v42  ;;  %v6367_v60 = vand.u32 4294901760, %v5192_v61 }
  0x76   :  { %4079 = vmatpush3.bf16.msra.mxu0 %v5077_v1  ;;  %1093 = vmatprep.mubr.f32.mxu0 %v1092_v39  ;;  %v5259_v39 = vsub.f32 %v62_v56, %v1020_v37  ;;  %6363 = vst [vmem:[#allocation11_spill] sm:$0xff] %v5265_v6  ;;  %v1263_v24 = vand.u32 4294901760, %v1262_v11  ;;  %v5274_v37 = vsub.f32 %v79_v62, %v1071_v20 }
  0x77   :  { %4071 = vmatpush3.bf16.msra.mxu1 %v6339_v31  ;;  %4081 = vmatprep.subr.bf16.mxu0 %v5079_v36  ;;  %v82_v31 = vld [vmem:[%s6172_s1 + $0x1e8] sm:$0xff]  ;;  %6365 = vst [vmem:[#allocation13_spill] sm:$0xff] %v5276_v2  ;;  %v1150_v56 = vsub.f32 %v5190_v52, %v6366_v13  ;;  %v5283_v11 = vpack.c.bf16 %v1144_v30, %v1137_v4  ;;  %v6373_v36 = vand.u32 4294901760, %v5276_v2 }
  0x78   :  { %4073 = vmatprep.subr.bf16.mxu1 %v6340_v32  ;;  %6362 = vst [vmem:[#allocation10_spill] sm:$0xff] %v5259_v39  ;;  %v5271_v32 = vld [vmem:[%s6172_s1 + $0x160] sm:$0xff]  ;;  %6364 = vst [vmem:[#allocation12_spill] sm:$0xff] %v5274_v37  ;;  %v5285_v16 = vpack.c.bf16 %v1026_v22, %v1023_v48  ;;  %v1157_v62 = vsub.f32 %v5192_v61, %v6367_v60  ;;  %v1080_v20 = vand.u32 4294901760, %v82_v31  ;;  %v5301_v30 = vld [vmem:[%s6172_s1 + $0x168] sm:$0xff]  ;;  %v6368_v60 = vand.u32 4294901760, %v5227_v9 }
  0x79   :  { %v5291_v49 = vsub.f32 %v63_v18, %v1023_v48  ;;  %v5293_v29 = vsub.f32 %v64_v58, %v1026_v22  ;;  %v4120_v13 = vpack.c.bf16 %v1270_v21, %v1263_v24  ;;  %v5312_v18 = vld [vmem:[%s6172_s1 + $0x1f0] sm:$0xff]  ;;  %v5317_v58 = vld [vmem:[%s6172_s1 + $0x1f8] sm:$0xff]  ;;  %v1151_v21 = vand.u32 4294901760, %v1150_v56 }
  0x7a   :  { %4083 = vmatpush3.bf16.msra.mxu0 %v5087_v12  ;;  %v5321_v24 = vsub.f32 %v81_v42, %v1077_v53  ;;  %v16_v22 = vld [vmem:[%s6173_s0 + $0x10] sm:$0xff]  ;;  %v1158_v48 = vand.u32 4294901760, %v1157_v62  ;;  %v5330_v4 = vpack.c.bf16 %v1080_v20, %v1077_v53  ;;  %v1032_v42 = vand.u32 4294901760, %v5301_v30 }
  0x7b   :  { %4075 = vmatpush3.bf16.msra.mxu1 %v6341_v26  ;;  %4085 = vmatprep.subr.bf16.mxu0 %v5115_v23  ;;  %v1276_v26 = vsub.f32 %v5200_v34, %v6236_v51  ;;  %v6369_v51 = vand.u32 4294901760, %v5271_v32  ;;  %v5346_v53 = vld [vmem:[%s6172_s1 + $0x170] sm:$0xff]  ;;  %v6372_v23 = vand.u32 4294901760, %v5274_v37 }
  0x7c   :  { %4109 = vmatprep.subr.bf16.mxu1 %v5166_v43  ;;  %v1283_v43 = vsub.f32 %v5227_v9, %v6368_v60 }
  0x7d   :  { %v1277_v56 = vand.u32 4294901760, %v1276_v26  ;;  %v5339_v60 = vsub.f32 %v5271_v32, %v6369_v51  ;;  %v6370_v51 = vand.u32 4294901760, %v5245_v5  ;;  %v1290_v12 = vsub.f32 %v5274_v37, %v6372_v23 }
  0x7e   :  { %987 = vmatmul.mubr.f32.vlgmr.msra.gmra.mrb[4].mxu1 %v4832_v57  ;;  %4087 = vmatpush3.bf16.msra.mxu0 %v5134_v0  ;;  %v5332_v57 = vsub.f32 %v82_v31, %v1080_v20  ;;  %v1083_v0 = vand.u32 4294901760, %v5312_v18  ;;  %v5351_v31 = vld [vmem:[%s6172_s1 + $0x178] sm:$0xff]  ;;  %v6371_v20 = vand.u32 4294901760, %v5259_v39 }
  0x7f   :  { %4111 = vmatpush3.bf16.msra.mxu1 %v5168_v10  ;;  %4089 = vmatprep.subr.bf16.mxu0 %v5148_v41  ;;  %v1086_v10 = vand.u32 4294901760, %v5317_v58  ;;  %v1164_v62 = vsub.f32 %v5245_v5, %v6370_v51  ;;  %v5360_v41 = vand.u32 4294901760, %v16_v22  ;;  %v1038_v23 = vand.u32 4294901760, %v5351_v31 }
  0x80   :  { %4113 = vmatprep.subr.bf16.mxu1 %v5219_v8  ;;  %1329 = vmatprep.mubr.f32.mxu1 %v5089_v44  ;;  %v1284_v8 = vand.u32 4294901760, %v1283_v43  ;;  %v1171_v26 = vsub.f32 %v5259_v39, %v6371_v20  ;;  %v1297_v43 = vsub.f32 %v5276_v2, %v6373_v36  ;;  %v4122_v20 = vpack.c.bf16 %v1158_v48, %v1151_v21 }
  0x81   :  { %v5374_v39 = vsub.f32 %v5301_v30, %v1032_v42  ;;  %v5380_v36 = vsub.f32 %v5312_v18, %v1083_v0  ;;  %v5383_v44 = vsub.f32 %v5317_v58, %v1086_v10  ;;  %v6261_v51 = vand.u32 4294901760, %v5332_v57 }
  0x82   :  { %4091 = vmatpush3.bf16.msra.mxu0 %v5174_v28  ;;  %v1035_v28 = vand.u32 4294901760, %v5346_v53  ;;  %v4124_v48 = vpack.c.bf16 %v1284_v8, %v1277_v56  ;;  %v1165_v21 = vand.u32 4294901760, %v1164_v62  ;;  %v1172_v30 = vand.u32 4294901760, %v1171_v26 }
  0x83   :  { %4115 = vmatpush3.bf16.msra.mxu1 %v5243_v59  ;;  %4093 = vmatprep.subr.bf16.mxu0 %v5221_v35  ;;  %v5388_v35 = vsub.f32 %v16_v22, %v5360_v41  ;;  %v1291_v2 = vand.u32 4294901760, %v1290_v12  ;;  %v6374_v18 = vand.u32 4294901760, %v5291_v49  ;;  %v6375_v58 = vand.u32 4294901760, %v5293_v29 }
  0x84   :  { %4117 = vmatprep.subr.bf16.mxu1 %v5255_v7  ;;  %v1298_v7 = vand.u32 4294901760, %v1297_v43  ;;  %v5400_v56 = vsub.f32 %v5346_v53, %v1035_v28  ;;  %v5403_v22 = vsub.f32 %v5351_v31, %v1038_v23  ;;  %v6376_v62 = vand.u32 4294901760, %v5321_v24 }
  0x85   :  { %v1178_v37 = vsub.f32 %v5291_v49, %v6374_v18  ;;  %v1185_v59 = vsub.f32 %v5293_v29, %v6375_v58  ;;  %v1317_v43 = vand.u32 4294901760, %v5380_v36  ;;  %v6377_v31 = vand.u32 4294901760, %v5271_v32 }
  0x86   :  { %4095 = vmatpush3.bf16.msra.mxu0 %v5257_v50  ;;  %v1304_v26 = vsub.f32 %v5321_v24, %v6376_v62  ;;  %v5419_v58 = vpack.c.bf16 %v1086_v10, %v1083_v0  ;;  %v4126_v8 = vpack.c.bf16 %v1172_v30, %v1165_v21  ;;  %v4128_v62 = vpack.c.bf16 %v1298_v7, %v1291_v2 }
  0x87   :  { %4119 = vmatpush3.bf16.msra.mxu1 %v5283_v11  ;;  %4097 = vmatprep.subr.bf16.mxu0 %v5265_v6  ;;  %v1311_v11 = vsub.f32 %v5332_v57, %v6261_v51  ;;  %v5417_v18 = vpack.c.bf16 %v1032_v42, %v6377_v31  ;;  %v1179_v12 = vand.u32 4294901760, %v1178_v37  ;;  %v1186_v6 = vand.u32 4294901760, %v1185_v59 }
  0x88   :  { %4121 = vmatprep.subr.bf16.mxu1 %v4120_v13  ;;  %v1096_v13 = vand.u32 4294901760, %v5388_v35  ;;  %v6378_v51 = vand.u32 4294901760, %v5339_v60  ;;  %v6379_v32 = vand.u32 4294901760, %v5374_v39  ;;  %v6262_v42 = vand.u32 4294901760, %v5400_v56 }
  0x89   :  { %v6263_v10 = vand.u32 4294901760, %v5403_v22  ;;  %v1305_v21 = vand.u32 4294901760, %v1304_v26  ;;  %v1312_v2 = vand.u32 4294901760, %v1311_v11  ;;  %v1318_v37 = vsub.f32 %v5380_v36, %v1317_v43 }
  0x8a   :  { %4099 = vmatpush3.bf16.msra.mxu0 %v5285_v16  ;;  %v1192_v53 = vsub.f32 %v5339_v60, %v6378_v51  ;;  %v1199_v0 = vsub.f32 %v5374_v39, %v6379_v32  ;;  %v1097_v51 = vsub.f32 %v5388_v35, %v1096_v13  ;;  %v5442_v30 = vpack.c.bf16 %v1038_v23, %v1035_v28 }
  0x8b   :  { %4123 = vmatpush3.bf16.msra.mxu1 %v4122_v20  ;;  %4101 = vmatprep.subr.bf16.mxu0 %v5330_v4  ;;  %v6380_v20 = vand.u32 4294901760, %v5383_v44  ;;  %v4130_v7 = vpack.c.bf16 %v1186_v6, %v1179_v12  ;;  %v1206_v31 = vsub.f32 %v5400_v56, %v6262_v42  ;;  %v1213_v32 = vsub.f32 %v5403_v22, %v6263_v10 }
  0x8c   :  { %4125 = vmatprep.subr.bf16.mxu1 %v4124_v48  ;;  %v4140_v48 = vpack.c.bf16 %v5010_v55, %v5002_v33  ;;  %v1193_v26 = vand.u32 4294901760, %v1192_v53  ;;  %v1200_v11 = vand.u32 4294901760, %v1199_v0  ;;  %v4132_v28 = vpack.c.bf16 %v1312_v2, %v1305_v21 }
  0x8d   :  { %v1325_v59 = vsub.f32 %v5383_v44, %v6380_v20  ;;  %v1319_v23 = vand.u32 4294901760, %v1318_v37  ;;  %v1098_v12 = vand.u32 4294901760, %v1097_v51  ;;  %v4144_v0 = vpack.c.bf16 %v5085_v14, %v5083_v15  ;;  %v6381_v51 = vld [vmem:[#allocation2_spill] sm:$0xff] }
  0x8e   :  { %4103 = vmatpush3.bf16.msra.mxu0 %v5417_v18  ;;  %v4134_v53 = vpack.c.bf16 %v1200_v11, %v1193_v26  ;;  %v1207_v20 = vand.u32 4294901760, %v1206_v31  ;;  %v1214_v42 = vand.u32 4294901760, %v1213_v32  ;;  %v4148_v2 = vpack.c.bf16 %v5119_v47, %v5117_v17  ;;  %v6384_v11 = vld [vmem:[#allocation3_spill] sm:$0xff]  ;;  %v6385_v31 = vld [vmem:[#allocation12_spill] sm:$0xff]  ;;  %v6386_v32 = vld [vmem:[#allocation13_spill] sm:$0xff] }
  0x8f   :  { %4127 = vmatpush3.bf16.msra.mxu1 %v4126_v8  ;;  %4105 = vmatprep.subr.bf16.mxu0 %v5419_v58  ;;  %v1326_v6 = vand.u32 4294901760, %v1325_v59  ;;  %v4142_v8 = vpack.c.bf16 %v5014_v63, %v5012_v46  ;;  %v4150_v37 = vpack.c.bf16 %v5138_v3, %v5136_v45  ;;  %v4152_v59 = vpack.c.bf16 %v5159_v27, %v5157_v25 }
  0x90   :  { %4129 = vmatprep.subr.bf16.mxu1 %v4128_v62  ;;  %v4146_v62 = vpack.c.bf16 %v5103_v38, %v5092_v40  ;;  %v4138_v21 = vpack.c.bf16 %v1214_v42, %v1207_v20  ;;  %v4154_v42 = vpack.c.bf16 %v5192_v61, %v5190_v52  ;;  %v4168_v20 = vpack.c.bf16 %v5383_v44, %v5380_v36 }
  0x91   :  { %v4136_v10 = vpack.c.bf16 %v1326_v6, %v1319_v23  ;;  %v6387_v23 = vld [vmem:[#allocation4_spill] sm:$0xff]  ;;  %v4162_v6 = vpack.c.bf16 %v5293_v29, %v5291_v49 }
  0x92   :  { %4107 = vmatpush3.bf16.msra.mxu0 %v5442_v30 }
  0x93   :  { %4131 = vmatpush3.bf16.msra.mxu1 %v4130_v7  ;;  %4141 = vmatprep.subr.bf16.mxu0 %v4140_v48  ;;  %v6382_v7 = vand.u32 4294901760, %v5122_v19  ;;  %v6383_v48 = vld [vmem:[#allocation10_spill] sm:$0xff] }
  0x94   :  { %4133 = vmatprep.subr.bf16.mxu1 %v4132_v28  ;;  %v4158_v26 = vpack.c.bf16 %v6383_v48, %v5245_v5  ;;  %v4160_v28 = vpack.c.bf16 %v6386_v32, %v6385_v31 }
  0x95   :  { %1099 = vmatmul.mubr.f32.vlgmr.msra.gmra.mrb[6].mxu0 %v1098_v12  ;;  %v6388_v12 = vld [vmem:[#allocation5_spill] sm:$0xff] }
  0x96   :  { %4143 = vmatpush3.bf16.msra.mxu0 %v4142_v8  ;;  %1466 = vmatprep.mubr.f32.mxu0 %v5122_v19  ;;  %v4164_v19 = vpack.c.bf16 %v5332_v57, %v5321_v24  ;;  %v6389_v8 = vld [vmem:[#allocation6_spill] sm:$0xff] }
  0x97   :  { %4135 = vmatpush3.bf16.msra.mxu1 %v4134_v53  ;;  %4145 = vmatprep.subr.bf16.mxu0 %v4144_v0  ;;  %v4166_v53 = vpack.c.bf16 %v5374_v39, %v5339_v60  ;;  %v6390_v0 = vld [vmem:[#allocation8_spill] sm:$0xff] }
  0x98   :  { %4137 = vmatprep.subr.bf16.mxu1 %v4136_v10  ;;  %v4156_v10 = vpack.c.bf16 %v5227_v9, %v5200_v34 }
  0x9a   :  { %4147 = vmatpush3.bf16.msra.mxu0 %v4146_v62  ;;  %v6391_v62 = vld [vmem:[#allocation9_spill] sm:$0xff] }
  0x9b   :  { %4139 = vmatpush3.bf16.msra.mxu1 %v4138_v21  ;;  %4149 = vmatprep.subr.bf16.mxu0 %v4148_v2  ;;  %v4170_v21 = vpack.c.bf16 %v5403_v22, %v5400_v56  ;;  %v6392_v2 = vand.u32 4294901760, %v5002_v33  ;;  %v101_v33 = vld [vmem:[%s6172_s1 + $0x280] sm:$0xff] }
  0x9c   :  { %4173 = vmatprep.subr.bf16.mxu1 %v5065_v54 }
  0x9e   :  { %1331 = vmatmul.mubr.f32.vlgmr.msra.gmra.mrb[6].mxu1 %v5360_v41  ;;  %4151 = vmatpush3.bf16.msra.mxu0 %v4150_v37  ;;  %v6393_v37 = vand.u32 4294901760, %v5010_v55  ;;  %v6399_v55 = vand.u32 4294901760, %v5092_v40  ;;  %v1903_v40 = vand.u32 4294901760, %v101_v33 }
  0x9f   :  { %4175 = vmatpush3.bf16.msra.mxu1 %v5077_v1  ;;  %4153 = vmatprep.subr.bf16.mxu0 %v4152_v59 }
  0xa0   :  { %4177 = vmatprep.subr.bf16.mxu1 %v6381_v51  ;;  %1573 = vmatprep.mubr.f32.mxu1 %v6382_v7  ;;  %v4204_v59 = vpack.c.bf16 %v6393_v37, %v6392_v2  ;;  %v6396_v7 = vand.u32 4294901760, %v5014_v63  ;;  %v86_v2 = vld [vmem:[%s6172_s1 + $0x208] sm:$0xff] }
  0xa2   :  { %4155 = vmatpush3.bf16.msra.mxu0 %v4154_v42  ;;  %v6394_v42 = vld [vmem:[#allocation11_spill] sm:$0xff] }
  0xa3   :  { %4179 = vmatpush3.bf16.msra.mxu1 %v6384_v11  ;;  %4157 = vmatprep.subr.bf16.mxu0 %v4156_v10  ;;  %v6395_v10 = vand.u32 4294901760, %v5012_v46  ;;  %v6400_v46 = vand.u32 4294901760, %v5103_v38  ;;  %v85_v38 = vld [vmem:[%s6172_s1 + $0x200] sm:$0xff] }
  0xa4   :  { %4181 = vmatprep.subr.bf16.mxu1 %v6387_v23 }
  0xa5   :  { %v4210_v63 = vpack.c.bf16 %v6400_v46, %v6399_v55  ;;  %v6409_v55 = vand.u32 4294901760, %v5192_v61  ;;  %v6413_v61 = vand.u32 4294901760, %v6383_v48  ;;  %v6417_v48 = vand.u32 4294901760, %v5293_v29  ;;  %v19_v29 = vld [vmem:[%s6173_s0 + $0x28] sm:$0xff] }
  0xa6   :  { %4159 = vmatpush3.bf16.msra.mxu0 %v4158_v26  ;;  %v4206_v26 = vpack.c.bf16 %v6396_v7, %v6395_v10  ;;  %v103_v10 = vld [vmem:[%s6172_s1 + $0x290] sm:$0xff]  ;;  %v104_v7 = vld [vmem:[%s6172_s1 + $0x298] sm:$0xff] }
  0xa7   :  { %4183 = vmatpush3.bf16.msra.mxu1 %v6388_v12  ;;  %4161 = vmatprep.subr.bf16.mxu0 %v4160_v28  ;;  %v6397_v28 = vand.u32 4294901760, %v5083_v15  ;;  %v6402_v15 = vand.u32 4294901760, %v5117_v17  ;;  %v6404_v17 = vand.u32 4294901760, %v5136_v45 }
  0xa8   :  { %4185 = vmatprep.subr.bf16.mxu1 %v6389_v8 }
  0xaa   :  { %4163 = vmatpush3.bf16.msra.mxu0 %v4162_v6  ;;  %v6398_v6 = vand.u32 4294901760, %v5085_v14  ;;  %v6403_v14 = vand.u32 4294901760, %v5119_v47  ;;  %v6405_v47 = vand.u32 4294901760, %v5138_v3  ;;  %v1858_v3 = vand.u32 4294901760, %v86_v2 }
  0xab   :  { %4187 = vmatpush3.bf16.msra.mxu1 %v6390_v0  ;;  %4165 = vmatprep.subr.bf16.mxu0 %v4164_v19 }
  0xac   :  { %4189 = vmatprep.subr.bf16.mxu1 %v6391_v62  ;;  %v4208_v19 = vpack.c.bf16 %v6398_v6, %v6397_v28  ;;  %v4214_v37 = vpack.c.bf16 %v6405_v47, %v6404_v17  ;;  %v6407_v28 = vand.u32 4294901760, %v5159_v27  ;;  %v1855_v6 = vand.u32 4294901760, %v85_v38 }
  0xad   :  { %v1912_v47 = vand.u32 4294901760, %v104_v7 }
  0xae   :  { %4167 = vmatpush3.bf16.msra.mxu0 %v4166_v53  ;;  %v6401_v53 = vld [vmem:[#allocation7_spill] sm:$0xff] }
  0xaf   :  { %4191 = vmatpush3.bf16.msra.mxu1 %v5257_v50  ;;  %4169 = vmatprep.subr.bf16.mxu0 %v4168_v20  ;;  %v4212_v20 = vpack.c.bf16 %v6403_v14, %v6402_v15  ;;  %v6411_v15 = vand.u32 4294901760, %v5227_v9  ;;  %v6415_v9 = vand.u32 4294901760, %v6386_v32  ;;  %v6418_v32 = vand.u32 4294901760, %v5321_v24 }
  0xb0   :  { %4193 = vmatprep.subr.bf16.mxu1 %v6394_v42  ;;  %v6420_v24 = vand.u32 4294901760, %v5339_v60  ;;  %v6424_v60 = vand.u32 4294901760, %v5403_v22  ;;  %v5643_v22 = vand.u32 4294901760, %v19_v29 }
  0xb2   :  { %4171 = vmatpush3.bf16.msra.mxu0 %v4170_v21  ;;  %v102_v21 = vld [vmem:[%s6172_s1 + $0x288] sm:$0xff]  ;;  %6426 = vst [vmem:[#allocation10_spill] sm:$0xff] %v5643_v22 }
  0xb3   :  { %4195 = vmatpush3.bf16.msra.mxu1 %v5285_v16  ;;  %4205 = vmatprep.subr.bf16.mxu0 %v4204_v59  ;;  %v1906_v59 = vand.u32 4294901760, %v102_v21 }
  0xb4   :  { %4197 = vmatprep.subr.bf16.mxu1 %v5330_v4 }
  0xb5   :  { %1469 = vmatmul.mubr.f32.vlgmr.msra.gmra.mrb[8].mxu0 %v5388_v35  ;;  %v5600_v35 = vsub.f32 %v85_v38, %v1855_v6 }
  0xb6   :  { %4207 = vmatpush3.bf16.msra.mxu0 %v4206_v26  ;;  %1743 = vmatprep.mubr.f32.mxu0 %v6401_v53  ;;  %v6406_v26 = vand.u32 4294901760, %v5157_v25  ;;  %v87_v25 = vld [vmem:[%s6172_s1 + $0x210] sm:$0xff] }
  0xb7   :  { %4199 = vmatpush3.bf16.msra.mxu1 %v5417_v18  ;;  %4209 = vmatprep.subr.bf16.mxu0 %v4208_v19  ;;  %v6408_v19 = vand.u32 4294901760, %v5190_v52  ;;  %v6412_v52 = vand.u32 4294901760, %v5245_v5  ;;  %v6416_v5 = vand.u32 4294901760, %v5291_v49  ;;  %v1861_v49 = vand.u32 4294901760, %v87_v25 }
  0xb8   :  { %4201 = vmatprep.subr.bf16.mxu1 %v5419_v58  ;;  %v4216_v45 = vpack.c.bf16 %v6407_v28, %v6406_v26  ;;  %v105_v26 = vld [vmem:[%s6172_s1 + $0x2a0] sm:$0xff]  ;;  %v106_v28 = vld [vmem:[%s6172_s1 + $0x2a8] sm:$0xff] }
  0xb9   :  { %v4218_v46 = vpack.c.bf16 %v6409_v55, %v6408_v19  ;;  %v4222_v27 = vpack.c.bf16 %v6413_v61, %v6412_v52  ;;  %v6419_v19 = vand.u32 4294901760, %v5332_v57  ;;  %v6421_v57 = vand.u32 4294901760, %v5374_v39 }
  0xba   :  { %4211 = vmatpush3.bf16.msra.mxu0 %v4210_v63  ;;  %v6410_v63 = vand.u32 4294901760, %v5200_v34  ;;  %v6414_v34 = vand.u32 4294901760, %v6385_v31  ;;  %v5589_v31 = vpack.c.bf16 %v6417_v48, %v6416_v5  ;;  %v1918_v38 = vand.u32 4294901760, %v106_v28 }
  0xbb   :  { %4203 = vmatpush3.bf16.msra.mxu1 %v5442_v30  ;;  %4213 = vmatprep.subr.bf16.mxu0 %v4212_v20  ;;  %v5561_v20 = vsub.f32 %v101_v33, %v1903_v40  ;;  %v1909_v33 = vand.u32 4294901760, %v103_v10  ;;  %v5595_v55 = vpack.c.bf16 %v6419_v19, %v6418_v32  ;;  %v5630_v61 = vsub.f32 %v104_v7, %v1912_v47  ;;  %v107_v7 = vld [vmem:[%s6172_s1 + $0x2b0] sm:$0xff] }
  0xbc   :  { %4237 = vmatprep.subr.bf16.mxu1 %v5065_v54  ;;  %v4220_v14 = vpack.c.bf16 %v6411_v15, %v6410_v63  ;;  %v88_v54 = vld [vmem:[%s6172_s1 + $0x218] sm:$0xff]  ;;  %v4224_v17 = vpack.c.bf16 %v6415_v9, %v6414_v34  ;;  %v5597_v63 = vsub.f32 %v102_v21, %v1906_v59  ;;  %v5612_v21 = vpack.c.bf16 %v6421_v57, %v6420_v24 }
  0xbd   :  { %v5628_v39 = vsub.f32 %v103_v10, %v1909_v33  ;;  %v5634_v34 = vpack.c.bf16 %v1858_v3, %v1855_v6  ;;  %v108_v6 = vld [vmem:[%s6172_s1 + $0x2b8] sm:$0xff]  ;;  %v6266_v5 = vand.u32 4294901760, %v5630_v61  ;;  %v5674_v48 = vsub.f32 %v19_v29, %v5643_v22 }
  0xbe   :  { %1577 = vmatmul.mubr.f32.vlgmr.msra.gmra.mrb[8].mxu1 %v1096_v13  ;;  %4215 = vmatpush3.bf16.msra.mxu0 %v4214_v37  ;;  %v5602_v13 = vsub.f32 %v86_v2, %v1858_v3  ;;  %v1864_v37 = vand.u32 4294901760, %v88_v54  ;;  %v6275_v2 = vand.u32 4294901760, %v5561_v20  ;;  %v6273_v36 = vand.u32 4294901760, %v5597_v63 }
  0xbf   :  { %4239 = vmatpush3.bf16.msra.mxu1 %v5077_v1  ;;  %4217 = vmatprep.subr.bf16.mxu0 %v4216_v45  ;;  %v1915_v1 = vand.u32 4294901760, %v105_v26  ;;  %v6422_v45 = vand.u32 4294901760, %v5383_v44  ;;  %6425 = vst [vmem:[#allocation2_spill] sm:$0xff] %v5634_v34  ;;  %v89_v44 = vld [vmem:[%s6172_s1 + $0x220] sm:$0xff] }
  0xc0   :  { %4241 = vmatprep.subr.bf16.mxu1 %v6381_v51  ;;  %1847 = vmatprep.mubr.f32.mxu1 %v6401_v53  ;;  %v6423_v51 = vand.u32 4294901760, %v5400_v56  ;;  %v5632_v53 = vpack.c.bf16 %v1906_v59, %v1903_v40  ;;  %v90_v56 = vld [vmem:[%s6172_s1 + $0x228] sm:$0xff]  ;;  %v5648_v40 = vpack.c.bf16 %v1864_v37, %v1861_v49  ;;  %v6272_v59 = vand.u32 4294901760, %v5600_v35 }
  0xc1   :  { %v5620_v15 = vpack.c.bf16 %v6422_v45, %v1317_v43  ;;  %v5646_v43 = vpack.c.bf16 %v1912_v47, %v1909_v33  ;;  %v6268_v10 = vand.u32 4294901760, %v5602_v13  ;;  %v5661_v3 = vsub.f32 %v88_v54, %v1864_v37 }
  0xc2   :  { %v5626_v52 = vpack.c.bf16 %v6424_v60, %v6423_v51  ;;  %4219 = vmatpush3.bf16.msra.mxu0 %v4218_v46  ;;  %6428 = vst [vmem:[#allocation12_spill] sm:$0xff] %v5648_v40  ;;  %v5663_v46 = vpack.c.bf16 %v1918_v38, %v1915_v1  ;;  %v1867_v9 = vand.u32 4294901760, %v89_v44  ;;  %v1870_v33 = vand.u32 4294901760, %v90_v56 }
  0xc3   :  { %4243 = vmatpush3.bf16.msra.mxu1 %v6384_v11  ;;  %4221 = vmatprep.subr.bf16.mxu0 %v4220_v14  ;;  %6427 = vst [vmem:[#allocation3_spill] sm:$0xff] %v5646_v43  ;;  %v5659_v11 = vsub.f32 %v87_v25, %v1861_v49  ;;  %v2082_v14 = vsub.f32 %v5561_v20, %v6275_v2  ;;  %v6267_v47 = vand.u32 4294901760, %v5628_v39  ;;  %v1921_v25 = vand.u32 4294901760, %v107_v7 }
  0xc4   :  { %4245 = vmatprep.subr.bf16.mxu1 %v6387_v23  ;;  %6429 = vst [vmem:[#allocation13_spill] sm:$0xff] %v5663_v46  ;;  %v2089_v23 = vsub.f32 %v5597_v63, %v6273_v36  ;;  %v1924_v54 = vand.u32 4294901760, %v108_v6  ;;  %v5677_v32 = vsub.f32 %v105_v26, %v1915_v1  ;;  %v1970_v19 = vsub.f32 %v5600_v35, %v6272_v59 }
  0xc5   :  { %v5686_v49 = vsub.f32 %v106_v28, %v1918_v38  ;;  %v2083_v37 = vand.u32 4294901760, %v2082_v14  ;;  %v6265_v26 = vand.u32 4294901760, %v5661_v3  ;;  %v5693_v29 = vpack.c.bf16 %v1870_v33, %v1867_v9  ;;  %v92_v28 = vld [vmem:[%s6172_s1 + $0x238] sm:$0xff] }
  0xc6   :  { %4223 = vmatpush3.bf16.msra.mxu0 %v4222_v27  ;;  %v1977_v27 = vsub.f32 %v5602_v13, %v6268_v10  ;;  %v5695_v24 = vsub.f32 %v89_v44, %v1867_v9  ;;  %v2096_v57 = vsub.f32 %v5628_v39, %v6267_v47  ;;  %v2090_v1 = vand.u32 4294901760, %v2089_v23 }
  0xc7   :  { %4247 = vmatpush3.bf16.msra.mxu1 %v6388_v12  ;;  %4225 = vmatprep.subr.bf16.mxu0 %v4224_v17  ;;  %v91_v12 = vld [vmem:[%s6172_s1 + $0x230] sm:$0xff]  ;;  %v6264_v17 = vand.u32 4294901760, %v5659_v11  ;;  %6430 = vst [vmem:[#allocation4_spill] sm:$0xff] %v5693_v29  ;;  %v5707_v38 = vsub.f32 %v90_v56, %v1870_v33  ;;  %v5709_v45 = vpack.c.bf16 %v1924_v54, %v1921_v25  ;;  %v6280_v51 = vand.u32 4294901760, %v5674_v48  ;;  %v110_v56 = vld [vmem:[%s6172_s1 + $0x2c8] sm:$0xff] }
  0xc8   :  { %4249 = vmatprep.subr.bf16.mxu1 %v6389_v8  ;;  %v2103_v8 = vsub.f32 %v5630_v61, %v6266_v5  ;;  %v1971_v60 = vand.u32 4294901760, %v1970_v19  ;;  %v1978_v44 = vand.u32 4294901760, %v1977_v27  ;;  %v5714_v14 = vsub.f32 %v107_v7, %v1921_v25 }
  0xc9   :  { %6431 = vst [vmem:[#allocation5_spill] sm:$0xff] %v5709_v45  ;;  %v1873_v9 = vand.u32 4294901760, %v91_v12  ;;  %v5723_v33 = vsub.f32 %v108_v6, %v1924_v54  ;;  %v1991_v7 = vsub.f32 %v5661_v3, %v6265_v26  ;;  %v2097_v23 = vand.u32 4294901760, %v2096_v57 }
  0xca   :  { %4227 = vmatpush3.bf16.msra.mxu0 %v5589_v31  ;;  %v109_v31 = vld [vmem:[%s6172_s1 + $0x2c0] sm:$0xff]  ;;  %v2104_v25 = vand.u32 4294901760, %v2103_v8  ;;  %v6270_v19 = vand.u32 4294901760, %v5677_v32  ;;  %v6269_v27 = vand.u32 4294901760, %v5686_v49  ;;  %v1930_v54 = vand.u32 4294901760, %v110_v56 }
  0xcb   :  { %4251 = vmatpush3.bf16.msra.mxu1 %v6390_v0  ;;  %4229 = vmatprep.subr.bf16.mxu0 %v5595_v55  ;;  %v1876_v0 = vand.u32 4294901760, %v92_v28  ;;  %v1984_v55 = vsub.f32 %v5659_v11, %v6264_v17  ;;  %v1927_v6 = vand.u32 4294901760, %v109_v31  ;;  %v93_v17 = vld [vmem:[%s6172_s1 + $0x240] sm:$0xff]  ;;  %v1953_v26 = vsub.f32 %v5674_v48, %v6280_v51 }
  0xcc   :  { %4253 = vmatprep.subr.bf16.mxu1 %v6391_v62  ;;  %v5734_v62 = vpack.c.bf16 %v2090_v1, %v2083_v37  ;;  %v5744_v57 = vpack.c.bf16 %v1978_v44, %v1971_v60  ;;  %v5746_v8 = vsub.f32 %v91_v12, %v1873_v9  ;;  %v6274_v37 = vand.u32 4294901760, %v5707_v38  ;;  %v111_v44 = vld [vmem:[%s6172_s1 + $0x2d0] sm:$0xff] }
  0xcd   :  { %v5751_v1 = vpack.c.bf16 %v1876_v0, %v1873_v9  ;;  %v5753_v5 = vsub.f32 %v92_v28, %v1876_v0  ;;  %v1985_v47 = vand.u32 4294901760, %v1984_v55  ;;  %v1992_v10 = vand.u32 4294901760, %v1991_v7  ;;  %v112_v9 = vld [vmem:[%s6172_s1 + $0x2d8] sm:$0xff] }
  0xce   :  { %4231 = vmatpush3.bf16.msra.mxu0 %v5612_v21  ;;  %v6271_v21 = vand.u32 4294901760, %v5695_v24  ;;  %v2110_v12 = vsub.f32 %v5677_v32, %v6270_v19  ;;  %v1879_v60 = vand.u32 4294901760, %v93_v17  ;;  %v5767_v28 = vpack.c.bf16 %v1930_v54, %v1927_v6 }
  0xcf   :  { %4255 = vmatpush3.bf16.msra.mxu1 %v5257_v50  ;;  %4233 = vmatprep.subr.bf16.mxu0 %v5620_v15  ;;  %6432 = vst [vmem:[#allocation6_spill] sm:$0xff] %v5751_v1  ;;  %v94_v50 = vld [vmem:[%s6172_s1 + $0x248] sm:$0xff]  ;;  %v5758_v15 = vpack.c.bf16 %v2104_v25, %v2097_v23  ;;  %v6276_v0 = vand.u32 4294901760, %v5714_v14  ;;  %v6277_v55 = vand.u32 4294901760, %v5723_v33  ;;  %v1954_v7 = vand.u32 4294901760, %v1953_v26 }
  0xd0   :  { %4257 = vmatprep.subr.bf16.mxu1 %v6394_v42  ;;  %v2117_v42 = vsub.f32 %v5686_v49, %v6269_v27  ;;  %6433 = vst [vmem:[#allocation8_spill] sm:$0xff] %v5767_v28  ;;  %v1882_v23 = vand.u32 4294901760, %v94_v50  ;;  %v1998_v25 = vsub.f32 %v5695_v24, %v6271_v21  ;;  %v2005_v27 = vsub.f32 %v5707_v38, %v6274_v37 }
  0xd1   :  { %v5788_v19 = vpack.c.bf16 %v1992_v10, %v1985_v47  ;;  %v5790_v26 = vsub.f32 %v110_v56, %v1930_v54  ;;  %v2111_v21 = vand.u32 4294901760, %v2110_v12  ;;  %v1933_v36 = vand.u32 4294901760, %v111_v44 }
  0xd2   :  { %4235 = vmatpush3.bf16.msra.mxu0 %v5626_v52  ;;  %v5779_v52 = vsub.f32 %v109_v31, %v1927_v6  ;;  %v6278_v31 = vand.u32 4294901760, %v5746_v8  ;;  %v6279_v6 = vand.u32 4294901760, %v5753_v5  ;;  %v2118_v59 = vand.u32 4294901760, %v2117_v42 }
  0xd3   :  { %4259 = vmatpush3.bf16.msra.mxu1 %v5285_v16  ;;  %4269 = vmatprep.subr.bf16.mxu0 %v5632_v53  ;;  %v95_v16 = vld [vmem:[%s6172_s1 + $0x250] sm:$0xff]  ;;  %v1936_v37 = vand.u32 4294901760, %v112_v9  ;;  %v5802_v10 = vsub.f32 %v93_v17, %v1879_v60  ;;  %v2124_v47 = vsub.f32 %v5714_v14, %v6276_v0  ;;  %v2131_v56 = vsub.f32 %v5723_v33, %v6277_v55 }
  0xd4   :  { %4261 = vmatprep.subr.bf16.mxu1 %v5330_v4  ;;  %v96_v4 = vld [vmem:[%s6172_s1 + $0x258] sm:$0xff]  ;;  %v5812_v54 = vpack.c.bf16 %v1882_v23, %v1879_v60  ;;  %v1999_v12 = vand.u32 4294901760, %v1998_v25  ;;  %v2006_v42 = vand.u32 4294901760, %v2005_v27  ;;  %v1885_v2 = vand.u32 4294901760, %v95_v16  ;;  %v114_v27 = vld [vmem:[%s6172_s1 + $0x2e8] sm:$0xff] }
  0xd5   :  { %1745 = vmatmul.mubr.f32.vlgmr.msra.gmra.mrb[10].mxu0 %v5360_v41  ;;  %v1888_v17 = vand.u32 4294901760, %v96_v4  ;;  %v2012_v0 = vsub.f32 %v5746_v8, %v6278_v31  ;;  %v6285_v60 = vand.u32 4294901760, %v5779_v52  ;;  %v5830_v25 = vsub.f32 %v94_v50, %v1882_v23  ;;  %v5849_v31 = vld [vmem:[%s6172_s1 + $0x260] sm:$0xff] }
  0xd6   :  { %4271 = vmatpush3.bf16.msra.mxu0 %v5634_v34  ;;  %1955 = vmatprep.mubr.f32.mxu0 %v1954_v7  ;;  %v2019_v7 = vsub.f32 %v5753_v5, %v6279_v6  ;;  %v5832_v55 = vpack.c.bf16 %v1936_v37, %v1933_v36  ;;  %v5836_v6 = vsub.f32 %v111_v44, %v1933_v36  ;;  %v2132_v34 = vand.u32 4294901760, %v2131_v56 }
  0xd7   :  { %4263 = vmatpush3.bf16.msra.mxu1 %v5417_v18  ;;  %4273 = vmatprep.subr.bf16.mxu0 %v5646_v43  ;;  %v113_v18 = vld [vmem:[%s6172_s1 + $0x2e0] sm:$0xff]  ;;  %v5838_v51 = vsub.f32 %v112_v9, %v1936_v37  ;;  %v2125_v43 = vand.u32 4294901760, %v2124_v47  ;;  %v1942_v23 = vand.u32 4294901760, %v114_v27  ;;  %v5852_v36 = vpack.c.bf16 %v1888_v17, %v1885_v2  ;;  %v5860_v9 = vld [vmem:[%s6172_s1 + $0x268] sm:$0xff] }
  0xd8   :  { %4265 = vmatprep.subr.bf16.mxu1 %v5419_v58  ;;  %v5828_v58 = vpack.c.bf16 %v2118_v59, %v2111_v21  ;;  %6434 = vst [vmem:[#allocation9_spill] sm:$0xff] %v5836_v6  ;;  %v5842_v59 = vpack.c.bf16 %v2006_v42, %v1999_v12  ;;  %v5844_v21 = vsub.f32 %v95_v16, %v1885_v2  ;;  %v1939_v50 = vand.u32 4294901760, %v113_v18  ;;  %v5877_v12 = vld [vmem:[%s6172_s1 + $0x2f8] sm:$0xff] }
  0xd9   :  { %6435 = vst [vmem:[#allocation11_spill] sm:$0xff] %v5838_v51  ;;  %v2013_v37 = vand.u32 4294901760, %v2012_v0  ;;  %v2020_v44 = vand.u32 4294901760, %v2019_v7  ;;  %v5862_v16 = vsub.f32 %v96_v4, %v1888_v17  ;;  %v6436_v47 = vand.u32 4294901760, %v5790_v26  ;;  %v5872_v0 = vld [vmem:[%s6172_s1 + $0x2f0] sm:$0xff] }
  0xda   :  { %4275 = vmatpush3.bf16.msra.mxu0 %v5648_v40  ;;  %v4312_v4 = vpack.c.bf16 %v2132_v34, %v2125_v43  ;;  %v1891_v42 = vand.u32 4294901760, %v5849_v31  ;;  %v1894_v34 = vand.u32 4294901760, %v5860_v9  ;;  %v1945_v17 = vand.u32 4294901760, %v5872_v0 }
  0xdb   :  { %4267 = vmatpush3.bf16.msra.mxu1 %v5442_v30  ;;  %4277 = vmatprep.subr.bf16.mxu0 %v5663_v46  ;;  %v2138_v30 = vsub.f32 %v5779_v52, %v6285_v60  ;;  %v2145_v56 = vsub.f32 %v5790_v26, %v6436_v47  ;;  %v18_v47 = vld [vmem:[%s6173_s0 + $0x20] sm:$0xff]  ;;  %v5889_v60 = vpack.c.bf16 %v1942_v23, %v1939_v50  ;;  %v1948_v2 = vand.u32 4294901760, %v5877_v12 }
  0xdc   :  { %4301 = vmatprep.subr.bf16.mxu1 %v5734_v62  ;;  %v5893_v62 = vsub.f32 %v114_v27, %v1942_v23  ;;  %v4314_v43 = vpack.c.bf16 %v2020_v44, %v2013_v37  ;;  %v6438_v23 = vand.u32 4294901760, %v5830_v25  ;;  %v5916_v44 = vand.u32 4294901760, %v18_v47 }
  0xdd   :  { %v2139_v7 = vand.u32 4294901760, %v2138_v30  ;;  %v2146_v27 = vand.u32 4294901760, %v2145_v56  ;;  %v6439_v30 = vand.u32 4294901760, %v5836_v6 }
  0xde   :  { %1849 = vmatmul.mubr.f32.vlgmr.msra.gmra.mrb[10].mxu1 %v5360_v41  ;;  %4279 = vmatpush3.bf16.msra.mxu0 %v5693_v29  ;;  %v5891_v41 = vsub.f32 %v113_v18, %v1939_v50  ;;  %v5907_v18 = vld [vmem:[%s6172_s1 + $0x278] sm:$0xff]  ;;  %v2033_v37 = vsub.f32 %v5830_v25, %v6438_v23  ;;  %v6440_v29 = vand.u32 4294901760, %v5838_v51  ;;  %v5930_v23 = vsub.f32 %v5849_v31, %v1891_v42 }
  0xdf   :  { %4303 = vmatpush3.bf16.msra.mxu1 %v5744_v57  ;;  %4281 = vmatprep.subr.bf16.mxu0 %v5709_v45  ;;  %v5902_v57 = vld [vmem:[%s6172_s1 + $0x270] sm:$0xff]  ;;  %v2152_v45 = vsub.f32 %v5836_v6, %v6439_v30  ;;  %v1900_v46 = vand.u32 4294901760, %v5907_v18  ;;  %v6304_v31 = vand.u32 4294901760, %v5893_v62 }
  0xe0   :  { %4305 = vmatprep.subr.bf16.mxu1 %v5758_v15  ;;  %2191 = vmatprep.mubr.f32.mxu1 %v5643_v22  ;;  %v6437_v15 = vand.u32 4294901760, %v5802_v10  ;;  %v2159_v56 = vsub.f32 %v5838_v51, %v6440_v29  ;;  %v1897_v30 = vand.u32 4294901760, %v5902_v57  ;;  %v5939_v29 = vsub.f32 %v5872_v0, %v1945_v17 }
  0xe1   :  { %v4316_v22 = vpack.c.bf16 %v2146_v27, %v2139_v7  ;;  %v5947_v51 = vsub.f32 %v18_v47, %v5916_v44  ;;  %v2153_v6 = vand.u32 4294901760, %v2152_v45  ;;  %v6441_v0 = vand.u32 4294901760, %v5844_v21 }
  0xe2   :  { %v2026_v50 = vsub.f32 %v5802_v10, %v6437_v15  ;;  %4283 = vmatpush3.bf16.msra.mxu0 %v5751_v1  ;;  %v5933_v1 = vsub.f32 %v5860_v9, %v1894_v34  ;;  %v5942_v15 = vsub.f32 %v5877_v12, %v1948_v2  ;;  %v2034_v9 = vand.u32 4294901760, %v2033_v37 }
  0xe3   :  { %4307 = vmatpush3.bf16.msra.mxu1 %v5788_v19  ;;  %4285 = vmatprep.subr.bf16.mxu0 %v5767_v28  ;;  %v2040_v40 = vsub.f32 %v5844_v21, %v6441_v0  ;;  %v6442_v12 = vand.u32 4294901760, %v5862_v16  ;;  %v5959_v7 = vsub.f32 %v5902_v57, %v1897_v30  ;;  %v5962_v47 = vsub.f32 %v5907_v18, %v1900_v46 }
  0xe4   :  { %4309 = vmatprep.subr.bf16.mxu1 %v5828_v58  ;;  %v2027_v28 = vand.u32 4294901760, %v2026_v50  ;;  %v2160_v58 = vand.u32 4294901760, %v2159_v56  ;;  %v6443_v50 = vand.u32 4294901760, %v5891_v41  ;;  %v6306_v57 = vand.u32 4294901760, %v5942_v15 }
  0xe5   :  { %v2047_v19 = vsub.f32 %v5862_v16, %v6442_v12  ;;  %v5974_v0 = vpack.c.bf16 %v1894_v34, %v1891_v42  ;;  %v5976_v18 = vpack.c.bf16 %v1948_v2, %v1945_v17  ;;  %v6308_v12 = vand.u32 4294901760, %v5947_v51 }
  0xe6   :  { %4287 = vmatpush3.bf16.msra.mxu0 %v5812_v54  ;;  %v2166_v37 = vsub.f32 %v5891_v41, %v6443_v50  ;;  %v4320_v27 = vpack.c.bf16 %v2160_v58, %v2153_v6  ;;  %v2041_v45 = vand.u32 4294901760, %v2040_v40  ;;  %v6445_v42 = vand.u32 4294901760, %v5933_v1 }
  0xe7   :  { %4311 = vmatpush3.bf16.msra.mxu1 %v5842_v59  ;;  %4289 = vmatprep.subr.bf16.mxu0 %v5832_v55  ;;  %v2173_v59 = vsub.f32 %v5893_v62, %v6304_v31  ;;  %v2048_v50 = vand.u32 4294901760, %v2047_v19  ;;  %v6444_v31 = vand.u32 4294901760, %v5930_v23  ;;  %v6305_v17 = vand.u32 4294901760, %v5959_v7 }
  0xe8   :  { %4313 = vmatprep.subr.bf16.mxu1 %v4312_v4  ;;  %v4318_v4 = vpack.c.bf16 %v2034_v9, %v2027_v28  ;;  %v2061_v2 = vsub.f32 %v5933_v1, %v6445_v42  ;;  %v6307_v34 = vand.u32 4294901760, %v5962_v47  ;;  %v2167_v28 = vand.u32 4294901760, %v2166_v37 }
  0xe9   :  { %v2054_v56 = vsub.f32 %v5930_v23, %v6444_v31  ;;  %v2174_v6 = vand.u32 4294901760, %v2173_v59  ;;  %v6446_v40 = vand.u32 4294901760, %v5939_v29  ;;  %v2187_v19 = vsub.f32 %v5942_v15, %v6306_v57 }
  0xea   :  { %4291 = vmatpush3.bf16.msra.mxu0 %v5852_v36  ;;  %v1959_v31 = vsub.f32 %v5947_v51, %v6308_v12  ;;  %v5999_v9 = vpack.c.bf16 %v1900_v46, %v1897_v30  ;;  %v4322_v58 = vpack.c.bf16 %v2048_v50, %v2041_v45  ;;  %v2062_v59 = vand.u32 4294901760, %v2061_v2 }
  0xeb   :  { %4315 = vmatpush3.bf16.msra.mxu1 %v4314_v43  ;;  %4293 = vmatprep.subr.bf16.mxu0 %v5889_v60  ;;  %v2180_v43 = vsub.f32 %v5939_v29, %v6446_v40  ;;  %v2055_v37 = vand.u32 4294901760, %v2054_v56  ;;  %v2068_v42 = vsub.f32 %v5959_v7, %v6305_v17  ;;  %v2075_v40 = vsub.f32 %v5962_v47, %v6307_v34 }
  0xec   :  { %4317 = vmatprep.subr.bf16.mxu1 %v4316_v22  ;;  %v4332_v22 = vpack.c.bf16 %v5597_v63, %v5561_v20  ;;  %v4324_v46 = vpack.c.bf16 %v2174_v6, %v2167_v28  ;;  %v2188_v45 = vand.u32 4294901760, %v2187_v19  ;;  %v1960_v50 = vand.u32 4294901760, %v1959_v31  ;;  %v6448_v31 = vld [vmem:[#allocation3_spill] sm:$0xff] }
  0xed   :  { %v2181_v30 = vand.u32 4294901760, %v2180_v43  ;;  %v4326_v56 = vpack.c.bf16 %v2062_v59, %v2055_v37  ;;  %v4336_v2 = vpack.c.bf16 %v5630_v61, %v5628_v39  ;;  %v2069_v17 = vand.u32 4294901760, %v2068_v42  ;;  %v6450_v37 = vld [vmem:[#allocation12_spill] sm:$0xff]  ;;  %v6451_v59 = vld [vmem:[#allocation9_spill] sm:$0xff]  ;;  %v6452_v42 = vld [vmem:[#allocation11_spill] sm:$0xff] }
  0xee   :  { %4295 = vmatpush3.bf16.msra.mxu0 %v5974_v0  ;;  %v2076_v57 = vand.u32 4294901760, %v2075_v40  ;;  %v4340_v6 = vpack.c.bf16 %v5686_v49, %v5677_v32  ;;  %v4342_v43 = vpack.c.bf16 %v5707_v38, %v5695_v24  ;;  %v4344_v19 = vpack.c.bf16 %v5723_v33, %v5714_v14 }
  0xef   :  { %4319 = vmatpush3.bf16.msra.mxu1 %v4318_v4  ;;  %4297 = vmatprep.subr.bf16.mxu0 %v5976_v18  ;;  %v4334_v4 = vpack.c.bf16 %v5602_v13, %v5600_v35  ;;  %v4328_v34 = vpack.c.bf16 %v2188_v45, %v2181_v30  ;;  %v4352_v40 = vpack.c.bf16 %v6452_v42, %v6451_v59  ;;  %v6454_v45 = vld [vmem:[#allocation4_spill] sm:$0xff] }
  0xf0   :  { %4321 = vmatprep.subr.bf16.mxu1 %v4320_v27  ;;  %v4338_v27 = vpack.c.bf16 %v5661_v3, %v5659_v11  ;;  %v4330_v28 = vpack.c.bf16 %v2076_v57, %v2069_v17  ;;  %v4346_v57 = vpack.c.bf16 %v5753_v5, %v5746_v8  ;;  %v6447_v17 = vld [vmem:[#allocation2_spill] sm:$0xff]  ;;  %v4354_v30 = vpack.c.bf16 %v5862_v16, %v5844_v21 }
  0xf2   :  { %4299 = vmatpush3.bf16.msra.mxu0 %v5999_v9 }
  0xf3   :  { %4323 = vmatpush3.bf16.msra.mxu1 %v4322_v58  ;;  %4333 = vmatprep.subr.bf16.mxu0 %v4332_v22  ;;  %v6449_v58 = vand.u32 4294901760, %v5674_v48  ;;  %v4350_v22 = vpack.c.bf16 %v5830_v25, %v5802_v10 }
  0xf4   :  { %4325 = vmatprep.subr.bf16.mxu1 %v4324_v46  ;;  %v6453_v46 = vld [vmem:[#allocation13_spill] sm:$0xff] }
  0xf5   :  { %1961 = vmatmul.mubr.f32.vlgmr.msra.gmra.mrb[12].mxu0 %v1960_v50  ;;  %v6455_v50 = vld [vmem:[#allocation5_spill] sm:$0xff] }
  0xf6   :  { %4335 = vmatpush3.bf16.msra.mxu0 %v4334_v4  ;;  %2328 = vmatprep.mubr.f32.mxu0 %v5674_v48  ;;  %v4356_v48 = vpack.c.bf16 %v5893_v62, %v5891_v41 }
  0xf7   :  { %4327 = vmatpush3.bf16.msra.mxu1 %v4326_v56  ;;  %4337 = vmatprep.subr.bf16.mxu0 %v4336_v2  ;;  %v4358_v2 = vpack.c.bf16 %v5933_v1, %v5930_v23 }
  0xf8   :  { %4329 = vmatprep.subr.bf16.mxu1 %v4328_v34  ;;  %v4348_v34 = vpack.c.bf16 %v5790_v26, %v5779_v52 }
  0xfa   :  { %4339 = vmatpush3.bf16.msra.mxu0 %v4338_v27 }
  0xfb   :  { %4331 = vmatpush3.bf16.msra.mxu1 %v4330_v28  ;;  %4341 = vmatprep.subr.bf16.mxu0 %v4340_v6  ;;  %v6456_v28 = vld [vmem:[#allocation6_spill] sm:$0xff]  ;;  %v4360_v6 = vpack.c.bf16 %v5942_v15, %v5939_v29 }
  0xfc   :  { %4365 = vmatprep.subr.bf16.mxu1 %v5632_v53 }
  0xfe   :  { %2193 = vmatmul.mubr.f32.vlgmr.msra.gmra.mrb[12].mxu1 %v5916_v44  ;;  %4343 = vmatpush3.bf16.msra.mxu0 %v4342_v43  ;;  %v6457_v43 = vld [vmem:[#allocation8_spill] sm:$0xff] }
  0xff   :  { %4367 = vmatpush3.bf16.msra.mxu1 %v6447_v17  ;;  %4345 = vmatprep.subr.bf16.mxu0 %v4344_v19  ;;  %v3193_v19 = vld [vmem:[%s6174_s2] ss:$0 sm:$0xff] }
 0x100   :  { %4369 = vmatprep.subr.bf16.mxu1 %v6448_v31  ;;  %2435 = vmatprep.mubr.f32.mxu1 %v6449_v58  ;;  %v6459_v58 = vand.u32 4294901760, %v5597_v63  ;;  %v6463_v63 = vand.u32 4294901760, %v5630_v61  ;;  %v6468_v61 = vand.u32 4294901760, %v5686_v49  ;;  %v6474_v49 = vand.u32 4294901760, %v5746_v8 }
 0x102   :  { %4347 = vmatpush3.bf16.msra.mxu0 %v4346_v57  ;;  %v4362_v57 = vpack.c.bf16 %v5962_v47, %v5959_v7 }
 0x103   :  { %4371 = vmatpush3.bf16.msra.mxu1 %v6450_v37  ;;  %4349 = vmatprep.subr.bf16.mxu0 %v4348_v34  ;;  %v6458_v34 = vand.u32 4294901760, %v5561_v20  ;;  %v6462_v20 = vand.u32 4294901760, %v5628_v39  ;;  %v6467_v39 = vand.u32 4294901760, %v5677_v32  ;;  %v6473_v32 = vand.u32 4294901760, %v5947_v51 }
 0x104   :  { %4373 = vmatprep.subr.bf16.mxu1 %v6453_v46 }
 0x106   :  { %4351 = vmatpush3.bf16.msra.mxu0 %v4350_v22  ;;  %v4396_v22 = vpack.c.bf16 %v6459_v58, %v6458_v34  ;;  %v4404_v34 = vpack.c.bf16 %v6468_v61, %v6467_v39 }
 0x107   :  { %4375 = vmatpush3.bf16.msra.mxu1 %v6454_v45  ;;  %4353 = vmatprep.subr.bf16.mxu0 %v4352_v40 }
 0x108   :  { %4377 = vmatprep.subr.bf16.mxu1 %v6455_v50  ;;  %v3226_v4 = vpop.f32.mrb[0].mxu0 }
 0x109   :  { %v3227_v56 = vpop.f32.mrb[1].mxu0 }
 0x10a   :  { %4355 = vmatpush3.bf16.msra.mxu0 %v4354_v30  ;;  %v3228_v27 = vadd.f32 %v3227_v56, %v3226_v4  ;;  %v6460_v4 = vand.u32 4294901760, %v5600_v35  ;;  %v6461_v56 = vand.u32 4294901760, %v5602_v13  ;;  %v6464_v35 = vand.u32 4294901760, %v5659_v11 }
 0x10b   :  { %4379 = vmatpush3.bf16.msra.mxu1 %v6456_v28  ;;  %4357 = vmatprep.subr.bf16.mxu0 %v4356_v48  ;;  %v6465_v13 = vand.u32 4294901760, %v5661_v3  ;;  %v6470_v11 = vand.u32 4294901760, %v5707_v38  ;;  %v6471_v3 = vand.u32 4294901760, %v5714_v14  ;;  %v6477_v14 = vand.u32 4294901760, %v5790_v26 }
 0x10c   :  { %4381 = vmatprep.subr.bf16.mxu1 %v6457_v43  ;;  %v239_v40 = vadd.f32 %v3228_v27, %v3193_v19  ;;  %v6482_v26 = vand.u32 4294901760, %v5844_v21 }
 0x10d   :  { %v4402_v19 = vpack.c.bf16 %v6465_v13, %v6464_v35 }
 0x10e   :  { %4359 = vmatpush3.bf16.msra.mxu0 %v4358_v2  ;;  %v4398_v2 = vpack.c.bf16 %v6461_v56, %v6460_v4 }
 0x10f   :  { %4383 = vmatpush3.bf16.msra.mxu1 %v5812_v54  ;;  %4361 = vmatprep.subr.bf16.mxu0 %v4360_v6  ;;  %v4400_v6 = vpack.c.bf16 %v6463_v63, %v6462_v20 }
 0x110   :  { %4385 = vmatprep.subr.bf16.mxu1 %v5832_v55 }
 0x111   :  { %v3261_v30 = vpop.f32.mrb[0].mxu1 }
 0x112   :  { %v3262_v48 = vpop.f32.mrb[1].mxu1  ;;  %4363 = vmatpush3.bf16.msra.mxu0 %v4362_v57  ;;  %v6466_v57 = vld [vmem:[#allocation10_spill] sm:$0xff] }
 0x113   :  { %v3263_v12 = vadd.f32 %v3262_v48, %v3261_v30  ;;  %4387 = vmatpush3.bf16.msra.mxu1 %v5852_v36  ;;  %4397 = vmatprep.subr.bf16.mxu0 %v4396_v22  ;;  %v6472_v22 = vand.u32 4294901760, %v5723_v33  ;;  %v6476_v30 = vand.u32 4294901760, %v5779_v52  ;;  %v6481_v52 = vand.u32 4294901760, %v6452_v42 }
 0x114   :  { %4389 = vmatprep.subr.bf16.mxu1 %v5889_v60 }
 0x115   :  { %v471_v27 = vadd.f32 %v3263_v12, %v239_v40  ;;  %2331 = vmatmul.mubr.f32.vlgmr.msra.gmra.mrb[14].mxu0 %v5947_v51  ;;  %v6469_v12 = vand.u32 4294901760, %v5695_v24  ;;  %v4408_v40 = vpack.c.bf16 %v6472_v22, %v6471_v3  ;;  %v6475_v24 = vand.u32 4294901760, %v5753_v5 }
 0x116   :  { %4399 = vmatpush3.bf16.msra.mxu0 %v4398_v2  ;;  %2605 = vmatprep.mubr.f32.mxu0 %v6466_v57  ;;  %v4412_v33 = vpack.c.bf16 %v6477_v14, %v6476_v30  ;;  %v6479_v51 = vand.u32 4294901760, %v5830_v25  ;;  %v6480_v5 = vand.u32 4294901760, %v6451_v59  ;;  %v6485_v25 = vand.u32 4294901760, %v5893_v62  ;;  %v20_v59 = vld [vmem:[%s6173_s0 + $0x30] sm:$0xff] }
 0x117   :  { %4391 = vmatpush3.bf16.msra.mxu1 %v5974_v0  ;;  %4401 = vmatprep.subr.bf16.mxu0 %v4400_v6  ;;  %v4406_v58 = vpack.c.bf16 %v6470_v11, %v6469_v12  ;;  %v4410_v38 = vpack.c.bf16 %v6475_v24, %v6474_v49  ;;  %v6486_v62 = vand.u32 4294901760, %v5930_v23  ;;  %v128_v56 = vsel %vm126_vm0, %v20_v59, 0 }
 0x118   :  { %4393 = vmatprep.subr.bf16.mxu1 %v5976_v18  ;;  %v6489_v2 = vand.u32 4294901760, %v5942_v15  ;;  %v2783_v13 = vand.u32 4294901760, %v128_v56  ;;  %v6490_v23 = vand.u32 4294901760, %v5959_v7  ;;  %v4495_v7 = vmov 0.0|0.0  }
 0x11a   :  { %4403 = vmatpush3.bf16.msra.mxu0 %v4402_v19 }
 0x11b   :  { %4395 = vmatpush3.bf16.msra.mxu1 %v5999_v9  ;;  %4405 = vmatprep.subr.bf16.mxu0 %v4404_v34 }
 0x11c   :  { %4429 = vmatprep.subr.bf16.mxu1 %v5632_v53  ;;  %v6478_v53 = vand.u32 4294901760, %v5802_v10  ;;  %v6484_v10 = vand.u32 4294901760, %v5891_v41  ;;  %v118_v41 = vld [vmem:[%s6172_s1 + $0x308] sm:$0xff] }
 0x11d   :  { %v2720_v35 = vand.u32 4294901760, %v118_v41 }
 0x11e   :  { %2439 = vmatmul.mubr.f32.vlgmr.msra.gmra.mrb[14].mxu1 %v6473_v32  ;;  %4407 = vmatpush3.bf16.msra.mxu0 %v4406_v58  ;;  %v4414_v8 = vpack.c.bf16 %v6479_v51, %v6478_v53 }
 0x11f   :  { %4431 = vmatpush3.bf16.msra.mxu1 %v6447_v17  ;;  %4409 = vmatprep.subr.bf16.mxu0 %v4408_v40  ;;  %v4416_v17 = vpack.c.bf16 %v6481_v52, %v6480_v5 }
 0x120   :  { %4433 = vmatprep.subr.bf16.mxu1 %v6448_v31  ;;  %2709 = vmatprep.mubr.f32.mxu1 %v6466_v57  ;;  %v6483_v31 = vand.u32 4294901760, %v5862_v16  ;;  %v117_v16 = vld [vmem:[%s6172_s1 + $0x300] sm:$0xff] }
 0x121   :  { %v2717_v6 = vand.u32 4294901760, %v117_v16 }
 0x122   :  { %4411 = vmatpush3.bf16.msra.mxu0 %v4410_v38  ;;  %v4418_v48 = vpack.c.bf16 %v6483_v31, %v6482_v26 }
 0x123   :  { %4435 = vmatpush3.bf16.msra.mxu1 %v6450_v37  ;;  %4413 = vmatprep.subr.bf16.mxu0 %v4412_v33  ;;  %v4420_v37 = vpack.c.bf16 %v6485_v25, %v6484_v10  ;;  %v2795_v57 = vsub.f32 %v117_v16, %v2717_v6 }
 0x124   :  { %4437 = vmatprep.subr.bf16.mxu1 %v6453_v46 }
 0x125   :  { %v2796_v39 = vand.u32 4294901760, %v2795_v57 }
 0x126   :  { %4415 = vmatpush3.bf16.msra.mxu0 %v4414_v8 }
 0x127   :  { %4439 = vmatpush3.bf16.msra.mxu1 %v6454_v45  ;;  %4417 = vmatprep.subr.bf16.mxu0 %v4416_v17  ;;  %v6487_v45 = vand.u32 4294901760, %v5933_v1  ;;  %v6491_v1 = vand.u32 4294901760, %v5962_v47  ;;  %v2797_v11 = vsub.f32 %v2795_v57, %v2796_v39 }
 0x128   :  { %v3296_v42 = vpop.f32.mrb[2].mxu0  ;;  %4441 = vmatprep.subr.bf16.mxu1 %v6455_v50  ;;  %v6488_v50 = vand.u32 4294901760, %v5939_v29  ;;  %v2784_v29 = vsub.f32 %v128_v56, %v2783_v13 }
 0x129   :  { %v3297_v21 = vpop.f32.mrb[3].mxu0  ;;  %v4422_v4 = vpack.c.bf16 %v6487_v45, %v6486_v62  ;;  %v4426_v19 = vpack.c.bf16 %v6491_v1, %v6490_v23 }
 0x12a   :  { %v3298_v46 = vadd.f32 %v3297_v21, %v3296_v42  ;;  %4419 = vmatpush3.bf16.msra.mxu0 %v4418_v48  ;;  %v4424_v20 = vpack.c.bf16 %v6489_v2, %v6488_v50 }
 0x12b   :  { %4443 = vmatpush3.bf16.msra.mxu1 %v6456_v28  ;;  %4421 = vmatprep.subr.bf16.mxu0 %v4420_v37  ;;  %v2802_v28 = vsub.f32 %v118_v41, %v2720_v35 }
 0x12c   :  { %v609_v63 = vadd.f32 %v3298_v46, %v471_v27  ;;  %4445 = vmatprep.subr.bf16.mxu1 %v6457_v43  ;;  %v4461_v43 = vpack.c.bf16 %v2720_v35, %v2717_v6 }
 0x12d   :  { %v2803_v61 = vand.u32 4294901760, %v2802_v28 }
 0x12e   :  { %4423 = vmatpush3.bf16.msra.mxu0 %v4422_v4 }
 0x12f   :  { %4447 = vmatpush3.bf16.msra.mxu1 %v5812_v54  ;;  %4425 = vmatprep.subr.bf16.mxu0 %v4424_v20  ;;  %v2785_v54 = vand.u32 4294901760, %v2784_v29  ;;  %v4473_v12 = vpack.c.bf16 %v2803_v61, %v2796_v39  ;;  %v2804_v58 = vsub.f32 %v2802_v28, %v2803_v61 }
 0x130   :  { %4449 = vmatprep.subr.bf16.mxu1 %v5832_v55  ;;  %v4497_v55 = vmov 0.0  }
 0x131   :  { %v3331_v15 = vpop.f32.mrb[2].mxu1  ;;  %v2805_v3 = vand.u32 4294901760, %v2804_v58 }
 0x132   :  { %v3332_v27 = vpop.f32.mrb[3].mxu1  ;;  %4427 = vmatpush3.bf16.msra.mxu0 %v4426_v19 }
 0x133   :  { %v3333_v34 = vadd.f32 %v3332_v27, %v3331_v15  ;;  %4451 = vmatpush3.bf16.msra.mxu1 %v5852_v36  ;;  %4469 = vmatprep.subr.bf16.mxu0 %v4495_v7  ;;  %v2798_v36 = vand.u32 4294901760, %v2797_v11 }
 0x134   :  { %4453 = vmatprep.subr.bf16.mxu1 %v5889_v60  ;;  %v2786_v60 = vsub.f32 %v2784_v29, %v2785_v54 }
 0x135   :  { %v717_v47 = vadd.f32 %v3333_v34, %v609_v63  ;;  %2607 = vmatmul.mubr.f32.vlgmr.msra.gmra.mrb[16].mxu0 %v5916_v44 }
 0x136   :  { %4471 = vmatpush3.bf16.msra.mxu0 %v4461_v43  ;;  %3867 = vmatprep.mubr.msk.f32.mxu0 %vm4496_vm1, %v4497_v55  ;;  %v2787_v22 = vand.u32 4294901760, %v2786_v60 }
 0x137   :  { %4455 = vmatpush3.bf16.msra.mxu1 %v5974_v0  ;;  %4472 = vmatprep.subr.bf16.mxu0 %v4495_v7  ;;  %v4464_v0 = vpack.c.bf16 %v2805_v3, %v2798_v36 }
 0x138   :  { %4457 = vmatprep.subr.bf16.mxu1 %v5976_v18  ;;  %v4467_v18 = vpack.c.bf16 %v2802_v28, %v2795_v57 }
 0x139   :  { %3868 = vmatmul.mubr.f32.vlgmr.msra.gmra.mrb[18].mxu0 %v2785_v54 }
 0x13a   :  { %4474 = vmatpush3.bf16.msra.mxu0 %v4473_v12  ;;  %3874 = vmatprep.mubr.msk.f32.mxu0 %vm4496_vm1, %v4497_v55 }
 0x13b   :  { %4459 = vmatpush3.bf16.msra.mxu1 %v5999_v9  ;;  %4475 = vmatprep.subr.bf16.mxu0 %v4495_v7 }
 0x13c   :  { %4460 = vmatprep.subr.bf16.mxu1 %v4495_v7 }
 0x13e   :  { %2711 = vmatmul.mubr.f32.vlgmr.msra.gmra.mrb[16].mxu1 %v5916_v44 }
 0x13f   :  { %4462 = vmatpush3.bf16.msra.mxu1 %v4461_v43  ;;  %3846 = vmatprep.mubr.msk.f32.mxu1 %vm4496_vm1, %v4497_v55 }
 0x140   :  { %4463 = vmatprep.subr.bf16.mxu1 %v4495_v7 }
 0x141   :  { %3875 = vmatmul.mubr.f32.vlgmr.msra.gmra.mrb[18].mxu0 %v2783_v13 }
 0x142   :  { %3847 = vmatmul.mubr.f32.vlgmr.msra.gmra.mrb[18].mxu1 %v2787_v22  ;;  %4477 = vmatpush3.bf16.msra.mxu0 %v4461_v43 }
 0x143   :  { %4465 = vmatpush3.bf16.msra.mxu1 %v4464_v0  ;;  %3853 = vmatprep.mubr.msk.f32.mxu1 %vm4496_vm1, %v4497_v55 }
 0x144   :  { %3881 = vmatprep.mubr.msk.f32.mxu0 %vm4496_vm1, %v4497_v55  ;;  %4466 = vmatprep.subr.bf16.mxu1 %v4495_v7 }
 0x148   :  { %v3366_v9 = vpop.f32.mrb[4].mxu0 }
 0x149   :  { %v3367_v40 = vpop.f32.mrb[5].mxu0  ;;  %3882 = vmatmul.mubr.f32.vlgmr.msra.gmra.mrb[18].mxu0 %v2783_v13 }
 0x14a   :  { %v3368_v44 = vadd.f32 %v3367_v40, %v3366_v9  ;;  %3854 = vmatmul.mubr.f32.vlgmr.msra.gmra.mrb[18].mxu1 %v2783_v13 }
 0x14b   :  { %4468 = vmatpush3.bf16.msra.mxu1 %v4467_v18  ;;  %3860 = vmatprep.mubr.msk.f32.mxu1 %vm4496_vm1, %v4497_v55 }
 0x14c   :  { %v885_v32 = vadd.f32 %v3368_v44, %v717_v47 }
 0x151   :  { %v3401_v49 = vpop.f32.mrb[4].mxu1 }
 0x152   :  { %v3402_v24 = vpop.f32.mrb[5].mxu1  ;;  %3861 = vmatmul.mubr.f32.vlgmr.msra.gmra.mrb[18].mxu1 %v2784_v29 }
 0x153   :  { %v3403_v38 = vadd.f32 %v3402_v24, %v3401_v49 }
 0x155   :  { %v989_v30 = vadd.f32 %v3403_v38, %v885_v32 }
 0x168   :  { %v3436_v14 = vpop.f32.mrb[6].mxu0 }
 0x169   :  { %v3437_v33 = vpop.f32.mrb[7].mxu0 }
 0x16a   :  { %v3438_v53 = vadd.f32 %v3437_v33, %v3436_v14 }
 0x16c   :  { %v1101_v51 = vadd.f32 %v3438_v53, %v989_v30 }
 0x171   :  { %v3471_v8 = vpop.f32.mrb[6].mxu1 }
 0x172   :  { %v3472_v5 = vpop.f32.mrb[7].mxu1 }
 0x173   :  { %v3473_v52 = vadd.f32 %v3472_v5, %v3471_v8 }
 0x175   :  { %v1333_v17 = vadd.f32 %v3473_v52, %v1101_v51 }
 0x188   :  { %v3506_v26 = vpop.f32.mrb[8].mxu0 }
 0x189   :  { %v3507_v31 = vpop.f32.mrb[9].mxu0 }
 0x18a   :  { %v3508_v48 = vadd.f32 %v3507_v31, %v3506_v26 }
 0x18c   :  { %v1471_v10 = vadd.f32 %v3508_v48, %v1333_v17 }
 0x191   :  { %v3541_v25 = vpop.f32.mrb[8].mxu1 }
 0x192   :  { %v3542_v37 = vpop.f32.mrb[9].mxu1 }
 0x193   :  { %v3543_v59 = vadd.f32 %v3542_v37, %v3541_v25 }
 0x195   :  { %v1579_v42 = vadd.f32 %v3543_v59, %v1471_v10 }
 0x1a8   :  { %v3576_v21 = vpop.f32.mrb[10].mxu0 }
 0x1a9   :  { %v3577_v16 = vpop.f32.mrb[11].mxu0 }
 0x1aa   :  { %v3578_v41 = vadd.f32 %v3577_v16, %v3576_v21 }
 0x1ac   :  { %v1747_v46 = vadd.f32 %v3578_v41, %v1579_v42 }
 0x1b1   :  { %v3611_v62 = vpop.f32.mrb[10].mxu1 }
 0x1b2   :  { %v3612_v45 = vpop.f32.mrb[11].mxu1 }
 0x1b3   :  { %v3613_v4 = vadd.f32 %v3612_v45, %v3611_v62 }
 0x1b5   :  { %v1851_v56 = vadd.f32 %v3613_v4, %v1747_v46 }
 0x1c8   :  { %v3646_v50 = vpop.f32.mrb[12].mxu0 }
 0x1c9   :  { %v3647_v2 = vpop.f32.mrb[13].mxu0 }
 0x1ca   :  { %v3648_v20 = vadd.f32 %v3647_v2, %v3646_v50 }
 0x1cc   :  { %v1963_v63 = vadd.f32 %v3648_v20, %v1851_v56 }
 0x1d1   :  { %v3681_v6 = vpop.f32.mrb[12].mxu1 }
 0x1d2   :  { %v3682_v35 = vpop.f32.mrb[13].mxu1 }
 0x1d3   :  { %v3683_v13 = vadd.f32 %v3682_v35, %v3681_v6 }
 0x1d5   :  { %v2195_v23 = vadd.f32 %v3683_v13, %v1963_v63 }
 0x1e8   :  { %v3716_v1 = vpop.f32.mrb[14].mxu0 }
 0x1e9   :  { %v3717_v19 = vpop.f32.mrb[15].mxu0 }
 0x1ea   :  { %v3718_v57 = vadd.f32 %v3717_v19, %v3716_v1 }
 0x1ec   :  { %v2333_v28 = vadd.f32 %v3718_v57, %v2195_v23 }
 0x1f1   :  { %v3751_v15 = vpop.f32.mrb[14].mxu1 }
 0x1f2   :  { %v3752_v29 = vpop.f32.mrb[15].mxu1 }
 0x1f3   :  { %v3753_v27 = vadd.f32 %v3752_v29, %v3751_v15 }
 0x1f5   :  { %v2441_v43 = vadd.f32 %v3753_v27, %v2333_v28 }
 0x208   :  { %v3786_v39 = vpop.f32.mrb[16].mxu0 }
 0x209   :  { %v3787_v61 = vpop.f32.mrb[17].mxu0 }
 0x20a   :  { %v3788_v34 = vadd.f32 %v3787_v61, %v3786_v39 }
 0x20c   :  { %v2609_v7 = vadd.f32 %v3788_v34, %v2441_v43 }
 0x211   :  { %v3821_v47 = vpop.f32.mrb[16].mxu1 }
 0x212   :  { %v3822_v54 = vpop.f32.mrb[17].mxu1 }
 0x213   :  { %v3823_v55 = vadd.f32 %v3822_v54, %v3821_v47 }
 0x215   :  { %v2713_v12 = vadd.f32 %v3823_v55, %v2609_v7 }
 0x21c   :  { %v3171_v11 = vpop.f32.mrb[18].mxu0 }
 0x21d   :  { %v3883_v58 = vpop.f32.mrb[19].mxu0 }
 0x225   :  { %v2946_v60 = vpop.f32.mrb[18].mxu1 }
 0x226   :  { %v4478_v36 = vadd.f32 %v2946_v60, %v2713_v12  ;;  %v3862_v3 = vpop.f32.mrb[19].mxu1 }
 0x228   :  { %v4479_v22 = vadd.f32 %v4478_v36, %v3171_v11 }
 0x22a   :  { %v3176_v0 = vsel %vm3175_vm2, %v4479_v22, -inf }
 0x22b   :  { %3177 = vmax.xlane.f32.xlu0 %v3176_v0 }
 0x2b8   :  { %v3178_v18 = vpop.xlane.xlu0 %3177 }
 0x2b9   :  { %v3179_v9 = vsub.f32 %v4479_v22, %v3178_v18 }
 0x2bb   :  { %v3180_v40 = vmul.f32 1.442695, %v3179_v9 }
 0x2bd   :  { %4491 = vpow2.f32 %v3180_v40 }
 0x2c7   :  { %v4492_v44 = vpop.eup %4491 }
 0x2c8   :  { %v3182_v32 = vsel %vm3175_vm2, %v4492_v44, 0.0 }
 0x2c9   :  { %3183 = vadd.xlane.f32.xlu0 %v3182_v32 }
 0x356   :  { %v3184_v49 = vpop.xlane.xlu0 %3183 }
 0x357   :  { %4493 = vlog2.f32 %v3184_v49 }
 0x361   :  { %v4494_v24 = vpop.eup %4493 }
 0x362   :  { %v3186_v38 = vmul.f32 0.6931472, %v4494_v24 }
 0x364   :  { %v3187_v30 = vsub.f32 %v3179_v9, %v3186_v38 }
 0x366   :  { %3188 = vst.msk [vmem:[%s6175_s3] sm:$0xff] %vm3175_vm2, %v3187_v30 }

</bundles_post_ra>
